<compile_context>
chip_gen: v7x
topology: tpu7x:2x2x1
jax: 0.10.0
libtpu: 0.0.40
codegen_flags: <defaults>
</compile_context>

<pallas_src>
import math

import jax
import jax.numpy as jnp
from jax.experimental import pallas as pl
from jax.experimental.pallas import tpu as pltpu

NTOKEN = 6
D_MODEL = 32
NHEAD = 2
HEAD_DIM = D_MODEL // NHEAD
D_HID = 32
NLAYERS = 3
LN_EPS = 1e-5

# ---- packed weight buffer (bf16, [rows, 32], all blocks 16-row aligned) ----
W_ENC_OFF = 0                                      # w_enc * sqrt(d_model)  (6 rows, pad->16)
W_LAYER_BASE = 16
W_QKV_ROWS = 3 * D_MODEL                           # fused Wqkv^T (96 rows; q rows pre-scaled)
W_LAYER_STRIDE = W_QKV_ROWS + 3 * D_MODEL          # qkv^T | w_out | w1 | w2   (192 rows)
W_MLP_BASE = W_LAYER_BASE + NLAYERS * W_LAYER_STRIDE   # wm0 | wm1 | wm2^T(+pad)
W_TOTAL = W_MLP_BASE + 2 * D_MODEL + 16            # 672

# ---- packed bias/LN buffer (f32, one [1, 32] row per vector) ----
B_ENC_ROW = 0
B_LAYER_BASE = 1
B_LAYER_STRIDE = 10                                # bq bk bv b_out b1 b2 g1 be1 g2 be2
B_MLP_BASE = B_LAYER_BASE + NLAYERS * B_LAYER_STRIDE   # bm0, bm1, bm2(replicated)
B_TOTAL = 40

# contract last dim of lhs with last dim of rhs (rhs used transposed, no vxpose)
NT_DIMS = (((1,), (1,)), ((), ()))


def transformer_kernel(src_ref, w_ref, b_ref, mask_ref, out_ref):
    def wmat(off, rows):
        return w_ref[pl.ds(off, rows), :]                        # bf16 [rows, 32]

    def brow(idx, width=D_MODEL):
        return b_ref[pl.ds(idx, 1), pl.ds(0, width)]             # f32 [1, width]

    def ln(y, g, bb):
        # single-pass LayerNorm: the two cross-lane reductions issue back-to-back
        s1 = jnp.sum(y, axis=-1, keepdims=True)
        s2 = jnp.sum(y * y, axis=-1, keepdims=True)
        mu = s1 * (1.0 / D_MODEL)
        var = s2 * (1.0 / D_MODEL) - mu * mu
        return (y - mu) * jax.lax.rsqrt(var + LN_EPS) * g + bb

    mask = mask_ref[...]                                         # [R, R] 0/1 same-batch mask

    # encoder linear; sqrt(d_model) folded into packed weight/bias
    x = jnp.dot(src_ref[...].astype(jnp.bfloat16), wmat(W_ENC_OFF, NTOKEN),
                preferred_element_type=jnp.float32) + brow(B_ENC_ROW)        # [R, D] f32

    for l in range(NLAYERS):
        wb = W_LAYER_BASE + l * W_LAYER_STRIDE
        bb = B_LAYER_BASE + l * B_LAYER_STRIDE

        # --- self attention (post-norm TransformerEncoderLayer) ---
        xb = x.astype(jnp.bfloat16)
        # fused QKV: one [R,32] x [96,32]^T matmul per layer
        qkv = jax.lax.dot_general(xb, wmat(wb, W_QKV_ROWS), NT_DIMS,
                                  preferred_element_type=jnp.float32)        # [R, 96]
        q = (qkv[:, 0:D_MODEL] + brow(bb + 0)).astype(jnp.bfloat16)  # 1/sqrt(hd) pre-folded
        k = (qkv[:, D_MODEL:2 * D_MODEL] + brow(bb + 1)).astype(jnp.bfloat16)
        v = (qkv[:, 2 * D_MODEL:3 * D_MODEL] + brow(bb + 2)).astype(jnp.bfloat16)

        heads = []
        for h in range(NHEAD):
            lo = h * HEAD_DIM
            s = jax.lax.dot_general(q[:, lo:lo + HEAD_DIM], k[:, lo:lo + HEAD_DIM],
                                    NT_DIMS, preferred_element_type=jnp.float32)  # [R, R]
            # scores are small (post-LN inputs, scale folded) -> skip max-subtraction;
            # cross-batch entries zeroed after exp (each row always attends to itself).
            p = jnp.exp(s) * mask
            p = p * pl.reciprocal(jnp.sum(p, axis=-1, keepdims=True), approx=True)
            heads.append(jnp.dot(p.astype(jnp.bfloat16), v[:, lo:lo + HEAD_DIM],
                                 preferred_element_type=jnp.float32))         # [R, hd]
        o = jnp.concatenate(heads, axis=-1).astype(jnp.bfloat16)              # [R, D]
        attn = jnp.dot(o, wmat(wb + W_QKV_ROWS, D_MODEL),
                       preferred_element_type=jnp.float32) + brow(bb + 3)
        x = ln(x + attn, brow(bb + 6), brow(bb + 7))                          # g1, be1

        # --- feed forward ---
        xb = x.astype(jnp.bfloat16)
        ff = jnp.maximum(
            jnp.dot(xb, wmat(wb + W_QKV_ROWS + D_MODEL, D_MODEL),
                    preferred_element_type=jnp.float32) + brow(bb + 4), 0.0)
        ff = jnp.dot(ff.astype(jnp.bfloat16), wmat(wb + W_QKV_ROWS + 2 * D_MODEL, D_MODEL),
                     preferred_element_type=jnp.float32) + brow(bb + 5)
        x = ln(x + ff, brow(bb + 8), brow(bb + 9))                            # g2, be2

    # --- ParNet head: Linear->relu->Linear->relu->Linear->sigmoid ---
    hdn = jnp.maximum(jnp.dot(x.astype(jnp.bfloat16), wmat(W_MLP_BASE, D_MODEL),
                              preferred_element_type=jnp.float32) + brow(B_MLP_BASE), 0.0)
    hdn = jnp.maximum(jnp.dot(hdn.astype(jnp.bfloat16), wmat(W_MLP_BASE + D_MODEL, D_MODEL),
                              preferred_element_type=jnp.float32) + brow(B_MLP_BASE + 1), 0.0)
    # final linear computed as wm2^T @ hdn^T -> lane-dense [1, R] row
    # (wm2^T stored padded to 16 zero rows; take row 0)
    logits16 = jax.lax.dot_general(wmat(W_MLP_BASE + 2 * D_MODEL, 16),
                                   hdn.astype(jnp.bfloat16), NT_DIMS,
                                   preferred_element_type=jnp.float32)        # [16, R]
    logits = logits16[0:1, :] + brow(B_MLP_BASE + 2, 1)                       # [1, R]
    heu = 1.0 / (1.0 + jnp.exp(-logits))                                      # exact sigmoid
    # heu = heu / heu.max() over all (seq, batch); exact reciprocal -> argmax is exactly 1
    out_ref[...] = heu / jnp.max(heu, axis=1, keepdims=True)


def pack_params(p):
    """Pack all parameters into one bf16 [W_TOTAL, 32] weight buffer and one f32
    [B_TOTAL, 32] bias/LN buffer (2 DMAs instead of ~20)."""
    scale = math.sqrt(D_MODEL)
    inv_sqrt_hd = 1.0 / math.sqrt(HEAD_DIM)

    w_rows = [p['w_enc'] * scale,
              jnp.zeros((W_LAYER_BASE - NTOKEN, D_MODEL), jnp.float32)]
    for l in range(NLAYERS):
        w_in_T = p['w_in'][l].T                            # [96, 32] = [out, in]
        w_rows.append(w_in_T[:D_MODEL] * inv_sqrt_hd)      # q rows, 1/sqrt(hd) folded
        w_rows.append(w_in_T[D_MODEL:])                    # k, v rows
        w_rows.append(p['w_out'][l])                       # [in, out]
        w_rows.append(p['w1'][l])
        w_rows.append(p['w2'][l])
    w_rows.append(p['wm0'])
    w_rows.append(p['wm1'])
    w_rows.append(p['wm2'].T)                              # [1, 32]
    w_rows.append(jnp.zeros((15, D_MODEL), jnp.float32))
    w_buf = jnp.concatenate(w_rows, axis=0).astype(jnp.bfloat16)
    assert w_buf.shape == (W_TOTAL, D_MODEL), w_buf.shape

    def row32(v):
        v = v.reshape(1, -1)
        return jnp.pad(v, ((0, 0), (0, D_MODEL - v.shape[1])))

    b_rows = [row32(p['b_enc'][0] * scale)]
    for l in range(NLAYERS):
        b_rows.append(row32(p['b_in'][l, 0, :D_MODEL] * inv_sqrt_hd))        # bq (scaled)
        b_rows.append(row32(p['b_in'][l, 0, D_MODEL:2 * D_MODEL]))           # bk
        b_rows.append(row32(p['b_in'][l, 0, 2 * D_MODEL:]))                  # bv
        b_rows.append(row32(p['b_out'][l, 0]))
        b_rows.append(row32(p['b1'][l, 0]))
        b_rows.append(row32(p['b2'][l, 0]))
        b_rows.append(row32(p['g1'][l, 0]))
        b_rows.append(row32(p['be1'][l, 0]))
        b_rows.append(row32(p['g2'][l, 0]))
        b_rows.append(row32(p['be2'][l, 0]))
    b_rows.append(row32(p['bm0'][0]))
    b_rows.append(row32(p['bm1'][0]))
    b_rows.append(jnp.broadcast_to(p['bm2'][0, 0], (1, D_MODEL)))
    b_rows.append(jnp.zeros((B_TOTAL - B_MLP_BASE - 3, D_MODEL), jnp.float32))
    b_buf = jnp.concatenate(b_rows, axis=0).astype(jnp.float32)
    assert b_buf.shape == (B_TOTAL, D_MODEL), b_buf.shape
    return w_buf, b_buf


def transformer_model_forward(src_sbf, packed):
    """src_sbf: [S, B, NTOKEN] (PyTorch layout).  Returns heu: [S, B]."""
    S, B, _ = src_sbf.shape
    R = S * B
    w_buf, b_buf = packed
    src = src_sbf.reshape(R, NTOKEN).astype(jnp.float32)   # seq-major rows: row = s*B + b
    # host-precomputed same-batch 0/1 mask (row i attends row j iff i%B == j%B)
    r = jnp.arange(R, dtype=jnp.int32)
    mask = (r[:, None] % B == r[None, :] % B).astype(jnp.float32)

    out = pl.pallas_call(
        transformer_kernel,
        grid=(1,),
        in_specs=[
            pl.BlockSpec((R, NTOKEN), lambda i: (0, 0)),
            pl.BlockSpec(w_buf.shape, lambda i: (0, 0)),
            pl.BlockSpec(b_buf.shape, lambda i: (0, 0)),
            pl.BlockSpec((R, R), lambda i: (0, 0)),
        ],
        out_specs=pl.BlockSpec((1, R), lambda i: (0, 0)),
        out_shape=jax.ShapeDtypeStruct((1, R), jnp.float32),
        compiler_params=pltpu.CompilerParams(dimension_semantics=("arbitrary",)),
    )(src, w_buf, b_buf, mask)
    return out.reshape(S, B)   # rows are (s, b)-ordered -> free reshape back to seq-first


def init_params(key):
    """Deterministic synthetic parameters. Weights stored pre-transposed as [in, out]."""
    def u(k, shape, s):
        return jax.random.uniform(k, shape, jnp.float32, -s, s)

    ks = iter(jax.random.split(key, 20))
    p = {}
    p['w_enc'] = u(next(ks), (NTOKEN, D_MODEL), 0.1)                      # init_weights() range
    p['b_enc'] = u(next(ks), (1, D_MODEL), 1.0 / math.sqrt(NTOKEN))
    s_d = 1.0 / math.sqrt(D_MODEL)
    p['w_in'] = u(next(ks), (NLAYERS, D_MODEL, 3 * D_MODEL), s_d)
    p['b_in'] = u(next(ks), (NLAYERS, 1, 3 * D_MODEL), s_d)
    p['w_out'] = u(next(ks), (NLAYERS, D_MODEL, D_MODEL), s_d)
    p['b_out'] = u(next(ks), (NLAYERS, 1, D_MODEL), s_d)
    p['w1'] = u(next(ks), (NLAYERS, D_MODEL, D_HID), s_d)
    p['b1'] = u(next(ks), (NLAYERS, 1, D_HID), s_d)
    p['w2'] = u(next(ks), (NLAYERS, D_HID, D_MODEL), 1.0 / math.sqrt(D_HID))
    p['b2'] = u(next(ks), (NLAYERS, 1, D_MODEL), 1.0 / math.sqrt(D_HID))
    p['g1'] = jnp.ones((NLAYERS, 1, D_MODEL), jnp.float32)
    p['be1'] = jnp.zeros((NLAYERS, 1, D_MODEL), jnp.float32)
    p['g2'] = jnp.ones((NLAYERS, 1, D_MODEL), jnp.float32)
    p['be2'] = jnp.zeros((NLAYERS, 1, D_MODEL), jnp.float32)
    p['wm0'] = u(next(ks), (D_MODEL, D_MODEL), s_d)
    p['bm0'] = u(next(ks), (1, D_MODEL), s_d)
    p['wm1'] = u(next(ks), (D_MODEL, D_MODEL), s_d)
    p['bm1'] = u(next(ks), (1, D_MODEL), s_d)
    p['wm2'] = u(next(ks), (D_MODEL, 1), s_d)
    p['bm2'] = u(next(ks), (1, 1), s_d)
    return p


def reference_forward(src_sbf, p):
    """Pure-JAX f32 reference mirroring the PyTorch module (post-norm encoder layers)."""
    x = src_sbf.astype(jnp.float32)
    S, B, _ = x.shape
    x = (jnp.einsum('sbf,fd->sbd', x, p['w_enc']) + p['b_enc'][0]) * math.sqrt(D_MODEL)

    def ln(y, g, b):
        mu = jnp.mean(y, axis=-1, keepdims=True)
        var = jnp.mean((y - mu) ** 2, axis=-1, keepdims=True)
        return (y - mu) * jax.lax.rsqrt(var + LN_EPS) * g + b

    for l in range(NLAYERS):
        qkv = jnp.einsum('sbd,de->sbe', x, p['w_in'][l]) + p['b_in'][l, 0]
        q, k, v = qkv[..., :D_MODEL], qkv[..., D_MODEL:2 * D_MODEL], qkv[..., 2 * D_MODEL:]
        qh = q.reshape(S, B, NHEAD, HEAD_DIM)
        kh = k.reshape(S, B, NHEAD, HEAD_DIM)
        vh = v.reshape(S, B, NHEAD, HEAD_DIM)
        scores = jnp.einsum('sbhd,tbhd->bhst', qh, kh) / math.sqrt(HEAD_DIM)
        probs = jax.nn.softmax(scores, axis=-1)
        o = jnp.einsum('bhst,tbhd->sbhd', probs, vh).reshape(S, B, D_MODEL)
        attn = jnp.einsum('sbd,de->sbe', o, p['w_out'][l]) + p['b_out'][l, 0]
        x = ln(x + attn, p['g1'][l, 0], p['be1'][l, 0])
        ff = jax.nn.relu(jnp.einsum('sbd,de->sbe', x, p['w1'][l]) + p['b1'][l, 0])
        ff = jnp.einsum('sbd,de->sbe', ff, p['w2'][l]) + p['b2'][l, 0]
        x = ln(x + ff, p['g2'][l, 0], p['be2'][l, 0])

    h = jax.nn.relu(x @ p['wm0'] + p['bm0'][0])
    h = jax.nn.relu(h @ p['wm1'] + p['bm1'][0])
    h = jax.nn.sigmoid(h @ p['wm2'] + p['bm2'][0])[..., 0]   # [S, B]
    return h / jnp.max(h)


if __name__ == "__main__":
    key = jax.random.PRNGKey(0)
    k_src, k_par = jax.random.split(key)

    S, B = 8, 2
    src = jax.random.normal(k_src, (S, B, NTOKEN), dtype=jnp.float32)  # [seq, batch, ntoken]
    params = init_params(k_par)
    packed = pack_params(params)

    heu = transformer_model_forward(src, packed)
    heu = jax.block_until_ready(heu)

    ref = jax.block_until_ready(reference_forward(src, params))
    assert heu.shape == (S, B), heu.shape
    max_err = float(jnp.max(jnp.abs(heu - ref)))
    if not (max_err < 3e-2):
        raise AssertionError(f"mismatch vs reference: max_err={max_err}")

    print("KERNEL_OK")
</pallas_src>

<mosaic_0001>
module attributes {stable_mosaic.version = 11 : i64} {
  func.func @transformer_kernel(%arg0: i32, %arg1: memref<16x6xf32, #tpu.memory_space<vmem>>, %arg2: memref<672x32xbf16, #tpu.memory_space<vmem>>, %arg3: memref<40x32xf32, #tpu.memory_space<vmem>>, %arg4: memref<16x16xf32, #tpu.memory_space<vmem>>, %arg5: memref<1x16xf32, #tpu.memory_space<vmem>>) attributes {dimension_semantics = [#tpu.dimension_semantics<arbitrary>], iteration_bounds = array<i64: 1>, scalar_prefetch = 0 : i64, scratch_operands = 0 : i64, tpu.core_type = #tpu.core_type<tc>, window_params = [{pipeline_mode = #tpu.pipeline_mode<synchronous>, transform_indices = @transform_0, window_bounds = array<i64: 16, 6>}, {pipeline_mode = #tpu.pipeline_mode<synchronous>, transform_indices = @transform_1, window_bounds = array<i64: 672, 32>}, {pipeline_mode = #tpu.pipeline_mode<synchronous>, transform_indices = @transform_2, window_bounds = array<i64: 40, 32>}, {pipeline_mode = #tpu.pipeline_mode<synchronous>, transform_indices = @transform_3, window_bounds = array<i64: 16, 16>}, {pipeline_mode = #tpu.pipeline_mode<synchronous>, transform_indices = @transform_4, window_bounds = array<i64: 1, 16>}]} {
    %c0 = arith.constant 0 : index
    %c0_0 = arith.constant 0 : index
    %0 = vector.load %arg4[%c0, %c0_0] : memref<16x16xf32, #tpu.memory_space<vmem>>, vector<16x16xf32>
    %c0_1 = arith.constant 0 : index
    %c0_2 = arith.constant 0 : index
    %1 = vector.load %arg1[%c0_1, %c0_2] : memref<16x6xf32, #tpu.memory_space<vmem>>, vector<16x6xf32>
    %2 = arith.truncf %1 : vector<16x6xf32> to vector<16x6xbf16>
    %c0_3 = arith.constant 0 : index
    %c0_4 = arith.constant 0 : index
    %3 = vector.load %arg2[%c0_3, %c0_4] : memref<672x32xbf16, #tpu.memory_space<vmem>>, vector<6x32xbf16>
    %cst = arith.constant dense<0.000000e+00> : vector<16x32xf32>
    %4 = tpu.matmul %2, %3, %cst {dimension_numbers = #tpu.dot_dimension_numbers<[1], [0], [0], [1], [0, 0, 1, 1], [], []>} : vector<16x6xbf16>, vector<6x32xbf16>, vector<16x32xf32> -> vector<16x32xf32>
    %c0_5 = arith.constant 0 : index
    %c0_6 = arith.constant 0 : index
    %5 = vector.load %arg3[%c0_5, %c0_6] : memref<40x32xf32, #tpu.memory_space<vmem>>, vector<1x32xf32>
    %6 = vector.broadcast %5 : vector<1x32xf32> to vector<16x32xf32>
    %7 = arith.addf %4, %6 : vector<16x32xf32>
    %8 = arith.truncf %7 : vector<16x32xf32> to vector<16x32xbf16>
    %c16 = arith.constant 16 : index
    %c0_7 = arith.constant 0 : index
    %9 = vector.load %arg2[%c16, %c0_7] : memref<672x32xbf16, #tpu.memory_space<vmem>>, vector<96x32xbf16>
    %cst_8 = arith.constant dense<0.000000e+00> : vector<16x96xf32>
    %10 = tpu.matmul %8, %9, %cst_8 {dimension_numbers = #tpu.dot_dimension_numbers<[1], [1], [0], [0], [0, 0, 1, 0], [], []>} : vector<16x32xbf16>, vector<96x32xbf16>, vector<16x96xf32> -> vector<16x96xf32>
    %11 = vector.extract_strided_slice %10 {offsets = [0, 0], sizes = [16, 32], strides = [1, 1]} : vector<16x96xf32> to vector<16x32xf32>
    %c1 = arith.constant 1 : index
    %c0_9 = arith.constant 0 : index
    %12 = vector.load %arg3[%c1, %c0_9] : memref<40x32xf32, #tpu.memory_space<vmem>>, vector<1x32xf32>
    %13 = vector.broadcast %12 : vector<1x32xf32> to vector<16x32xf32>
    %14 = arith.addf %11, %13 : vector<16x32xf32>
    %15 = arith.truncf %14 : vector<16x32xf32> to vector<16x32xbf16>
    %16 = vector.extract_strided_slice %10 {offsets = [0, 32], sizes = [16, 32], strides = [1, 1]} : vector<16x96xf32> to vector<16x32xf32>
    %c2 = arith.constant 2 : index
    %c0_10 = arith.constant 0 : index
    %17 = vector.load %arg3[%c2, %c0_10] : memref<40x32xf32, #tpu.memory_space<vmem>>, vector<1x32xf32>
    %18 = vector.broadcast %17 : vector<1x32xf32> to vector<16x32xf32>
    %19 = arith.addf %16, %18 : vector<16x32xf32>
    %20 = arith.truncf %19 : vector<16x32xf32> to vector<16x32xbf16>
    %21 = vector.extract_strided_slice %10 {offsets = [0, 64], sizes = [16, 32], strides = [1, 1]} : vector<16x96xf32> to vector<16x32xf32>
    %c3 = arith.constant 3 : index
    %c0_11 = arith.constant 0 : index
    %22 = vector.load %arg3[%c3, %c0_11] : memref<40x32xf32, #tpu.memory_space<vmem>>, vector<1x32xf32>
    %23 = vector.broadcast %22 : vector<1x32xf32> to vector<16x32xf32>
    %24 = arith.addf %21, %23 : vector<16x32xf32>
    %25 = arith.truncf %24 : vector<16x32xf32> to vector<16x32xbf16>
    %26 = vector.extract_strided_slice %15 {offsets = [0, 0], sizes = [16, 16], strides = [1, 1]} : vector<16x32xbf16> to vector<16x16xbf16>
    %27 = vector.extract_strided_slice %20 {offsets = [0, 0], sizes = [16, 16], strides = [1, 1]} : vector<16x32xbf16> to vector<16x16xbf16>
    %cst_12 = arith.constant dense<0.000000e+00> : vector<16x16xf32>
    %28 = tpu.matmul %26, %27, %cst_12 {dimension_numbers = #tpu.dot_dimension_numbers<[1], [1], [0], [0], [0, 0, 1, 0], [], []>} : vector<16x16xbf16>, vector<16x16xbf16>, vector<16x16xf32> -> vector<16x16xf32>
    %29 = math.exp %28 : vector<16x16xf32>
    %30 = arith.mulf %29, %0 : vector<16x16xf32>
    %cst_13 = arith.constant dense<0.000000e+00> : vector<16xf32>
    %31 = vector.multi_reduction <add>, %30, %cst_13 [1] : vector<16x16xf32> to vector<16xf32>
    %32 = vector.shape_cast %31 : vector<16xf32> to vector<16x1xf32>
    %33 = tpu.reciprocal %32 {approx = true} : vector<16x1xf32> -> vector<16x1xf32>
    %34 = vector.broadcast %33 : vector<16x1xf32> to vector<16x16xf32>
    %35 = arith.mulf %30, %34 : vector<16x16xf32>
    %36 = arith.truncf %35 : vector<16x16xf32> to vector<16x16xbf16>
    %37 = vector.extract_strided_slice %25 {offsets = [0, 0], sizes = [16, 16], strides = [1, 1]} : vector<16x32xbf16> to vector<16x16xbf16>
    %cst_14 = arith.constant dense<0.000000e+00> : vector<16x16xf32>
    %38 = tpu.matmul %36, %37, %cst_14 {dimension_numbers = #tpu.dot_dimension_numbers<[1], [0], [0], [1], [0, 0, 1, 1], [], []>} : vector<16x16xbf16>, vector<16x16xbf16>, vector<16x16xf32> -> vector<16x16xf32>
    %39 = vector.extract_strided_slice %15 {offsets = [0, 16], sizes = [16, 16], strides = [1, 1]} : vector<16x32xbf16> to vector<16x16xbf16>
    %40 = vector.extract_strided_slice %20 {offsets = [0, 16], sizes = [16, 16], strides = [1, 1]} : vector<16x32xbf16> to vector<16x16xbf16>
    %cst_15 = arith.constant dense<0.000000e+00> : vector<16x16xf32>
    %41 = tpu.matmul %39, %40, %cst_15 {dimension_numbers = #tpu.dot_dimension_numbers<[1], [1], [0], [0], [0, 0, 1, 0], [], []>} : vector<16x16xbf16>, vector<16x16xbf16>, vector<16x16xf32> -> vector<16x16xf32>
    %42 = math.exp %41 : vector<16x16xf32>
    %43 = arith.mulf %42, %0 : vector<16x16xf32>
    %cst_16 = arith.constant dense<0.000000e+00> : vector<16xf32>
    %44 = vector.multi_reduction <add>, %43, %cst_16 [1] : vector<16x16xf32> to vector<16xf32>
    %45 = vector.shape_cast %44 : vector<16xf32> to vector<16x1xf32>
    %46 = tpu.reciprocal %45 {approx = true} : vector<16x1xf32> -> vector<16x1xf32>
    %47 = vector.broadcast %46 : vector<16x1xf32> to vector<16x16xf32>
    %48 = arith.mulf %43, %47 : vector<16x16xf32>
    %49 = arith.truncf %48 : vector<16x16xf32> to vector<16x16xbf16>
    %50 = vector.extract_strided_slice %25 {offsets = [0, 16], sizes = [16, 16], strides = [1, 1]} : vector<16x32xbf16> to vector<16x16xbf16>
    %cst_17 = arith.constant dense<0.000000e+00> : vector<16x16xf32>
    %51 = tpu.matmul %49, %50, %cst_17 {dimension_numbers = #tpu.dot_dimension_numbers<[1], [0], [0], [1], [0, 0, 1, 1], [], []>} : vector<16x16xbf16>, vector<16x16xbf16>, vector<16x16xf32> -> vector<16x16xf32>
    %52 = tpu.concatenate %38, %51 in 1 : vector<16x16xf32>, vector<16x16xf32> -> vector<16x32xf32>
    %53 = arith.truncf %52 : vector<16x32xf32> to vector<16x32xbf16>
    %c112 = arith.constant 112 : index
    %c0_18 = arith.constant 0 : index
    %54 = vector.load %arg2[%c112, %c0_18] : memref<672x32xbf16, #tpu.memory_space<vmem>>, vector<32x32xbf16>
    %cst_19 = arith.constant dense<0.000000e+00> : vector<16x32xf32>
    %55 = tpu.matmul %53, %54, %cst_19 {dimension_numbers = #tpu.dot_dimension_numbers<[1], [0], [0], [1], [0, 0, 1, 1], [], []>} : vector<16x32xbf16>, vector<32x32xbf16>, vector<16x32xf32> -> vector<16x32xf32>
    %c4 = arith.constant 4 : index
    %c0_20 = arith.constant 0 : index
    %56 = vector.load %arg3[%c4, %c0_20] : memref<40x32xf32, #tpu.memory_space<vmem>>, vector<1x32xf32>
    %57 = vector.broadcast %56 : vector<1x32xf32> to vector<16x32xf32>
    %58 = arith.addf %55, %57 : vector<16x32xf32>
    %59 = arith.addf %7, %58 : vector<16x32xf32>
    %c7 = arith.constant 7 : index
    %c0_21 = arith.constant 0 : index
    %60 = vector.load %arg3[%c7, %c0_21] : memref<40x32xf32, #tpu.memory_space<vmem>>, vector<1x32xf32>
    %c8 = arith.constant 8 : index
    %c0_22 = arith.constant 0 : index
    %61 = vector.load %arg3[%c8, %c0_22] : memref<40x32xf32, #tpu.memory_space<vmem>>, vector<1x32xf32>
    %cst_23 = arith.constant dense<0.000000e+00> : vector<16xf32>
    %62 = vector.multi_reduction <add>, %59, %cst_23 [1] : vector<16x32xf32> to vector<16xf32>
    %63 = vector.shape_cast %62 : vector<16xf32> to vector<16x1xf32>
    %64 = arith.mulf %59, %59 : vector<16x32xf32>
    %cst_24 = arith.constant dense<0.000000e+00> : vector<16xf32>
    %65 = vector.multi_reduction <add>, %64, %cst_24 [1] : vector<16x32xf32> to vector<16xf32>
    %66 = vector.shape_cast %65 : vector<16xf32> to vector<16x1xf32>
    %cst_25 = arith.constant 3.125000e-02 : f32
    %67 = vector.broadcast %cst_25 : f32 to vector<16x1xf32>
    %68 = arith.mulf %63, %67 : vector<16x1xf32>
    %cst_26 = arith.constant 3.125000e-02 : f32
    %69 = vector.broadcast %cst_26 : f32 to vector<16x1xf32>
    %70 = arith.mulf %66, %69 : vector<16x1xf32>
    %71 = arith.mulf %68, %68 : vector<16x1xf32>
    %72 = arith.subf %70, %71 : vector<16x1xf32>
    %73 = vector.broadcast %68 : vector<16x1xf32> to vector<16x32xf32>
    %74 = arith.subf %59, %73 : vector<16x32xf32>
    %cst_27 = arith.constant 9.99999974E-6 : f32
    %75 = vector.broadcast %cst_27 : f32 to vector<16x1xf32>
    %76 = arith.addf %72, %75 : vector<16x1xf32>
    %77 = math.rsqrt %76 : vector<16x1xf32>
    %78 = vector.broadcast %77 : vector<16x1xf32> to vector<16x32xf32>
    %79 = arith.mulf %74, %78 : vector<16x32xf32>
    %80 = vector.broadcast %60 : vector<1x32xf32> to vector<16x32xf32>
    %81 = arith.mulf %79, %80 : vector<16x32xf32>
    %82 = vector.broadcast %61 : vector<1x32xf32> to vector<16x32xf32>
    %83 = arith.addf %81, %82 : vector<16x32xf32>
    %84 = arith.truncf %83 : vector<16x32xf32> to vector<16x32xbf16>
    %c144 = arith.constant 144 : index
    %c0_28 = arith.constant 0 : index
    %85 = vector.load %arg2[%c144, %c0_28] : memref<672x32xbf16, #tpu.memory_space<vmem>>, vector<32x32xbf16>
    %cst_29 = arith.constant dense<0.000000e+00> : vector<16x32xf32>
    %86 = tpu.matmul %84, %85, %cst_29 {dimension_numbers = #tpu.dot_dimension_numbers<[1], [0], [0], [1], [0, 0, 1, 1], [], []>} : vector<16x32xbf16>, vector<32x32xbf16>, vector<16x32xf32> -> vector<16x32xf32>
    %c5 = arith.constant 5 : index
    %c0_30 = arith.constant 0 : index
    %87 = vector.load %arg3[%c5, %c0_30] : memref<40x32xf32, #tpu.memory_space<vmem>>, vector<1x32xf32>
    %88 = vector.broadcast %87 : vector<1x32xf32> to vector<16x32xf32>
    %89 = arith.addf %86, %88 : vector<16x32xf32>
    %cst_31 = arith.constant 0.000000e+00 : f32
    %90 = vector.broadcast %cst_31 : f32 to vector<16x32xf32>
    %91 = arith.maximumf %89, %90 : vector<16x32xf32>
    %92 = arith.truncf %91 : vector<16x32xf32> to vector<16x32xbf16>
    %c176 = arith.constant 176 : index
    %c0_32 = arith.constant 0 : index
    %93 = vector.load %arg2[%c176, %c0_32] : memref<672x32xbf16, #tpu.memory_space<vmem>>, vector<32x32xbf16>
    %cst_33 = arith.constant dense<0.000000e+00> : vector<16x32xf32>
    %94 = tpu.matmul %92, %93, %cst_33 {dimension_numbers = #tpu.dot_dimension_numbers<[1], [0], [0], [1], [0, 0, 1, 1], [], []>} : vector<16x32xbf16>, vector<32x32xbf16>, vector<16x32xf32> -> vector<16x32xf32>
    %c6 = arith.constant 6 : index
    %c0_34 = arith.constant 0 : index
    %95 = vector.load %arg3[%c6, %c0_34] : memref<40x32xf32, #tpu.memory_space<vmem>>, vector<1x32xf32>
    %96 = vector.broadcast %95 : vector<1x32xf32> to vector<16x32xf32>
    %97 = arith.addf %94, %96 : vector<16x32xf32>
    %98 = arith.addf %83, %97 : vector<16x32xf32>
    %c9 = arith.constant 9 : index
    %c0_35 = arith.constant 0 : index
    %99 = vector.load %arg3[%c9, %c0_35] : memref<40x32xf32, #tpu.memory_space<vmem>>, vector<1x32xf32>
    %c10 = arith.constant 10 : index
    %c0_36 = arith.constant 0 : index
    %100 = vector.load %arg3[%c10, %c0_36] : memref<40x32xf32, #tpu.memory_space<vmem>>, vector<1x32xf32>
    %cst_37 = arith.constant dense<0.000000e+00> : vector<16xf32>
    %101 = vector.multi_reduction <add>, %98, %cst_37 [1] : vector<16x32xf32> to vector<16xf32>
    %102 = vector.shape_cast %101 : vector<16xf32> to vector<16x1xf32>
    %103 = arith.mulf %98, %98 : vector<16x32xf32>
    %cst_38 = arith.constant dense<0.000000e+00> : vector<16xf32>
    %104 = vector.multi_reduction <add>, %103, %cst_38 [1] : vector<16x32xf32> to vector<16xf32>
    %105 = vector.shape_cast %104 : vector<16xf32> to vector<16x1xf32>
    %cst_39 = arith.constant 3.125000e-02 : f32
    %106 = vector.broadcast %cst_39 : f32 to vector<16x1xf32>
    %107 = arith.mulf %102, %106 : vector<16x1xf32>
    %cst_40 = arith.constant 3.125000e-02 : f32
    %108 = vector.broadcast %cst_40 : f32 to vector<16x1xf32>
    %109 = arith.mulf %105, %108 : vector<16x1xf32>
    %110 = arith.mulf %107, %107 : vector<16x1xf32>
    %111 = arith.subf %109, %110 : vector<16x1xf32>
    %112 = vector.broadcast %107 : vector<16x1xf32> to vector<16x32xf32>
    %113 = arith.subf %98, %112 : vector<16x32xf32>
    %cst_41 = arith.constant 9.99999974E-6 : f32
    %114 = vector.broadcast %cst_41 : f32 to vector<16x1xf32>
    %115 = arith.addf %111, %114 : vector<16x1xf32>
    %116 = math.rsqrt %115 : vector<16x1xf32>
    %117 = vector.broadcast %116 : vector<16x1xf32> to vector<16x32xf32>
    %118 = arith.mulf %113, %117 : vector<16x32xf32>
    %119 = vector.broadcast %99 : vector<1x32xf32> to vector<16x32xf32>
    %120 = arith.mulf %118, %119 : vector<16x32xf32>
    %121 = vector.broadcast %100 : vector<1x32xf32> to vector<16x32xf32>
    %122 = arith.addf %120, %121 : vector<16x32xf32>
    %123 = arith.truncf %122 : vector<16x32xf32> to vector<16x32xbf16>
    %c208 = arith.constant 208 : index
    %c0_42 = arith.constant 0 : index
    %124 = vector.load %arg2[%c208, %c0_42] : memref<672x32xbf16, #tpu.memory_space<vmem>>, vector<96x32xbf16>
    %cst_43 = arith.constant dense<0.000000e+00> : vector<16x96xf32>
    %125 = tpu.matmul %123, %124, %cst_43 {dimension_numbers = #tpu.dot_dimension_numbers<[1], [1], [0], [0], [0, 0, 1, 0], [], []>} : vector<16x32xbf16>, vector<96x32xbf16>, vector<16x96xf32> -> vector<16x96xf32>
    %126 = vector.extract_strided_slice %125 {offsets = [0, 0], sizes = [16, 32], strides = [1, 1]} : vector<16x96xf32> to vector<16x32xf32>
    %c11 = arith.constant 11 : index
    %c0_44 = arith.constant 0 : index
    %127 = vector.load %arg3[%c11, %c0_44] : memref<40x32xf32, #tpu.memory_space<vmem>>, vector<1x32xf32>
    %128 = vector.broadcast %127 : vector<1x32xf32> to vector<16x32xf32>
    %129 = arith.addf %126, %128 : vector<16x32xf32>
    %130 = arith.truncf %129 : vector<16x32xf32> to vector<16x32xbf16>
    %131 = vector.extract_strided_slice %125 {offsets = [0, 32], sizes = [16, 32], strides = [1, 1]} : vector<16x96xf32> to vector<16x32xf32>
    %c12 = arith.constant 12 : index
    %c0_45 = arith.constant 0 : index
    %132 = vector.load %arg3[%c12, %c0_45] : memref<40x32xf32, #tpu.memory_space<vmem>>, vector<1x32xf32>
    %133 = vector.broadcast %132 : vector<1x32xf32> to vector<16x32xf32>
    %134 = arith.addf %131, %133 : vector<16x32xf32>
    %135 = arith.truncf %134 : vector<16x32xf32> to vector<16x32xbf16>
    %136 = vector.extract_strided_slice %125 {offsets = [0, 64], sizes = [16, 32], strides = [1, 1]} : vector<16x96xf32> to vector<16x32xf32>
    %c13 = arith.constant 13 : index
    %c0_46 = arith.constant 0 : index
    %137 = vector.load %arg3[%c13, %c0_46] : memref<40x32xf32, #tpu.memory_space<vmem>>, vector<1x32xf32>
    %138 = vector.broadcast %137 : vector<1x32xf32> to vector<16x32xf32>
    %139 = arith.addf %136, %138 : vector<16x32xf32>
    %140 = arith.truncf %139 : vector<16x32xf32> to vector<16x32xbf16>
    %141 = vector.extract_strided_slice %130 {offsets = [0, 0], sizes = [16, 16], strides = [1, 1]} : vector<16x32xbf16> to vector<16x16xbf16>
    %142 = vector.extract_strided_slice %135 {offsets = [0, 0], sizes = [16, 16], strides = [1, 1]} : vector<16x32xbf16> to vector<16x16xbf16>
    %cst_47 = arith.constant dense<0.000000e+00> : vector<16x16xf32>
    %143 = tpu.matmul %141, %142, %cst_47 {dimension_numbers = #tpu.dot_dimension_numbers<[1], [1], [0], [0], [0, 0, 1, 0], [], []>} : vector<16x16xbf16>, vector<16x16xbf16>, vector<16x16xf32> -> vector<16x16xf32>
    %144 = math.exp %143 : vector<16x16xf32>
    %145 = arith.mulf %144, %0 : vector<16x16xf32>
    %cst_48 = arith.constant dense<0.000000e+00> : vector<16xf32>
    %146 = vector.multi_reduction <add>, %145, %cst_48 [1] : vector<16x16xf32> to vector<16xf32>
    %147 = vector.shape_cast %146 : vector<16xf32> to vector<16x1xf32>
    %148 = tpu.reciprocal %147 {approx = true} : vector<16x1xf32> -> vector<16x1xf32>
    %149 = vector.broadcast %148 : vector<16x1xf32> to vector<16x16xf32>
    %150 = arith.mulf %145, %149 : vector<16x16xf32>
    %151 = arith.truncf %150 : vector<16x16xf32> to vector<16x16xbf16>
    %152 = vector.extract_strided_slice %140 {offsets = [0, 0], sizes = [16, 16], strides = [1, 1]} : vector<16x32xbf16> to vector<16x16xbf16>
    %cst_49 = arith.constant dense<0.000000e+00> : vector<16x16xf32>
    %153 = tpu.matmul %151, %152, %cst_49 {dimension_numbers = #tpu.dot_dimension_numbers<[1], [0], [0], [1], [0, 0, 1, 1], [], []>} : vector<16x16xbf16>, vector<16x16xbf16>, vector<16x16xf32> -> vector<16x16xf32>
    %154 = vector.extract_strided_slice %130 {offsets = [0, 16], sizes = [16, 16], strides = [1, 1]} : vector<16x32xbf16> to vector<16x16xbf16>
    %155 = vector.extract_strided_slice %135 {offsets = [0, 16], sizes = [16, 16], strides = [1, 1]} : vector<16x32xbf16> to vector<16x16xbf16>
    %cst_50 = arith.constant dense<0.000000e+00> : vector<16x16xf32>
    %156 = tpu.matmul %154, %155, %cst_50 {dimension_numbers = #tpu.dot_dimension_numbers<[1], [1], [0], [0], [0, 0, 1, 0], [], []>} : vector<16x16xbf16>, vector<16x16xbf16>, vector<16x16xf32> -> vector<16x16xf32>
    %157 = math.exp %156 : vector<16x16xf32>
    %158 = arith.mulf %157, %0 : vector<16x16xf32>
    %cst_51 = arith.constant dense<0.000000e+00> : vector<16xf32>
    %159 = vector.multi_reduction <add>, %158, %cst_51 [1] : vector<16x16xf32> to vector<16xf32>
    %160 = vector.shape_cast %159 : vector<16xf32> to vector<16x1xf32>
    %161 = tpu.reciprocal %160 {approx = true} : vector<16x1xf32> -> vector<16x1xf32>
    %162 = vector.broadcast %161 : vector<16x1xf32> to vector<16x16xf32>
    %163 = arith.mulf %158, %162 : vector<16x16xf32>
    %164 = arith.truncf %163 : vector<16x16xf32> to vector<16x16xbf16>
    %165 = vector.extract_strided_slice %140 {offsets = [0, 16], sizes = [16, 16], strides = [1, 1]} : vector<16x32xbf16> to vector<16x16xbf16>
    %cst_52 = arith.constant dense<0.000000e+00> : vector<16x16xf32>
    %166 = tpu.matmul %164, %165, %cst_52 {dimension_numbers = #tpu.dot_dimension_numbers<[1], [0], [0], [1], [0, 0, 1, 1], [], []>} : vector<16x16xbf16>, vector<16x16xbf16>, vector<16x16xf32> -> vector<16x16xf32>
    %167 = tpu.concatenate %153, %166 in 1 : vector<16x16xf32>, vector<16x16xf32> -> vector<16x32xf32>
    %168 = arith.truncf %167 : vector<16x32xf32> to vector<16x32xbf16>
    %c304 = arith.constant 304 : index
    %c0_53 = arith.constant 0 : index
    %169 = vector.load %arg2[%c304, %c0_53] : memref<672x32xbf16, #tpu.memory_space<vmem>>, vector<32x32xbf16>
    %cst_54 = arith.constant dense<0.000000e+00> : vector<16x32xf32>
    %170 = tpu.matmul %168, %169, %cst_54 {dimension_numbers = #tpu.dot_dimension_numbers<[1], [0], [0], [1], [0, 0, 1, 1], [], []>} : vector<16x32xbf16>, vector<32x32xbf16>, vector<16x32xf32> -> vector<16x32xf32>
    %c14 = arith.constant 14 : index
    %c0_55 = arith.constant 0 : index
    %171 = vector.load %arg3[%c14, %c0_55] : memref<40x32xf32, #tpu.memory_space<vmem>>, vector<1x32xf32>
    %172 = vector.broadcast %171 : vector<1x32xf32> to vector<16x32xf32>
    %173 = arith.addf %170, %172 : vector<16x32xf32>
    %174 = arith.addf %122, %173 : vector<16x32xf32>
    %c17 = arith.constant 17 : index
    %c0_56 = arith.constant 0 : index
    %175 = vector.load %arg3[%c17, %c0_56] : memref<40x32xf32, #tpu.memory_space<vmem>>, vector<1x32xf32>
    %c18 = arith.constant 18 : index
    %c0_57 = arith.constant 0 : index
    %176 = vector.load %arg3[%c18, %c0_57] : memref<40x32xf32, #tpu.memory_space<vmem>>, vector<1x32xf32>
    %cst_58 = arith.constant dense<0.000000e+00> : vector<16xf32>
    %177 = vector.multi_reduction <add>, %174, %cst_58 [1] : vector<16x32xf32> to vector<16xf32>
    %178 = vector.shape_cast %177 : vector<16xf32> to vector<16x1xf32>
    %179 = arith.mulf %174, %174 : vector<16x32xf32>
    %cst_59 = arith.constant dense<0.000000e+00> : vector<16xf32>
    %180 = vector.multi_reduction <add>, %179, %cst_59 [1] : vector<16x32xf32> to vector<16xf32>
    %181 = vector.shape_cast %180 : vector<16xf32> to vector<16x1xf32>
    %cst_60 = arith.constant 3.125000e-02 : f32
    %182 = vector.broadcast %cst_60 : f32 to vector<16x1xf32>
    %183 = arith.mulf %178, %182 : vector<16x1xf32>
    %cst_61 = arith.constant 3.125000e-02 : f32
    %184 = vector.broadcast %cst_61 : f32 to vector<16x1xf32>
    %185 = arith.mulf %181, %184 : vector<16x1xf32>
    %186 = arith.mulf %183, %183 : vector<16x1xf32>
    %187 = arith.subf %185, %186 : vector<16x1xf32>
    %188 = vector.broadcast %183 : vector<16x1xf32> to vector<16x32xf32>
    %189 = arith.subf %174, %188 : vector<16x32xf32>
    %cst_62 = arith.constant 9.99999974E-6 : f32
    %190 = vector.broadcast %cst_62 : f32 to vector<16x1xf32>
    %191 = arith.addf %187, %190 : vector<16x1xf32>
    %192 = math.rsqrt %191 : vector<16x1xf32>
    %193 = vector.broadcast %192 : vector<16x1xf32> to vector<16x32xf32>
    %194 = arith.mulf %189, %193 : vector<16x32xf32>
    %195 = vector.broadcast %175 : vector<1x32xf32> to vector<16x32xf32>
    %196 = arith.mulf %194, %195 : vector<16x32xf32>
    %197 = vector.broadcast %176 : vector<1x32xf32> to vector<16x32xf32>
    %198 = arith.addf %196, %197 : vector<16x32xf32>
    %199 = arith.truncf %198 : vector<16x32xf32> to vector<16x32xbf16>
    %c336 = arith.constant 336 : index
    %c0_63 = arith.constant 0 : index
    %200 = vector.load %arg2[%c336, %c0_63] : memref<672x32xbf16, #tpu.memory_space<vmem>>, vector<32x32xbf16>
    %cst_64 = arith.constant dense<0.000000e+00> : vector<16x32xf32>
    %201 = tpu.matmul %199, %200, %cst_64 {dimension_numbers = #tpu.dot_dimension_numbers<[1], [0], [0], [1], [0, 0, 1, 1], [], []>} : vector<16x32xbf16>, vector<32x32xbf16>, vector<16x32xf32> -> vector<16x32xf32>
    %c15 = arith.constant 15 : index
    %c0_65 = arith.constant 0 : index
    %202 = vector.load %arg3[%c15, %c0_65] : memref<40x32xf32, #tpu.memory_space<vmem>>, vector<1x32xf32>
    %203 = vector.broadcast %202 : vector<1x32xf32> to vector<16x32xf32>
    %204 = arith.addf %201, %203 : vector<16x32xf32>
    %cst_66 = arith.constant 0.000000e+00 : f32
    %205 = vector.broadcast %cst_66 : f32 to vector<16x32xf32>
    %206 = arith.maximumf %204, %205 : vector<16x32xf32>
    %207 = arith.truncf %206 : vector<16x32xf32> to vector<16x32xbf16>
    %c368 = arith.constant 368 : index
    %c0_67 = arith.constant 0 : index
    %208 = vector.load %arg2[%c368, %c0_67] : memref<672x32xbf16, #tpu.memory_space<vmem>>, vector<32x32xbf16>
    %cst_68 = arith.constant dense<0.000000e+00> : vector<16x32xf32>
    %209 = tpu.matmul %207, %208, %cst_68 {dimension_numbers = #tpu.dot_dimension_numbers<[1], [0], [0], [1], [0, 0, 1, 1], [], []>} : vector<16x32xbf16>, vector<32x32xbf16>, vector<16x32xf32> -> vector<16x32xf32>
    %c16_69 = arith.constant 16 : index
    %c0_70 = arith.constant 0 : index
    %210 = vector.load %arg3[%c16_69, %c0_70] : memref<40x32xf32, #tpu.memory_space<vmem>>, vector<1x32xf32>
    %211 = vector.broadcast %210 : vector<1x32xf32> to vector<16x32xf32>
    %212 = arith.addf %209, %211 : vector<16x32xf32>
    %213 = arith.addf %198, %212 : vector<16x32xf32>
    %c19 = arith.constant 19 : index
    %c0_71 = arith.constant 0 : index
    %214 = vector.load %arg3[%c19, %c0_71] : memref<40x32xf32, #tpu.memory_space<vmem>>, vector<1x32xf32>
    %c20 = arith.constant 20 : index
    %c0_72 = arith.constant 0 : index
    %215 = vector.load %arg3[%c20, %c0_72] : memref<40x32xf32, #tpu.memory_space<vmem>>, vector<1x32xf32>
    %cst_73 = arith.constant dense<0.000000e+00> : vector<16xf32>
    %216 = vector.multi_reduction <add>, %213, %cst_73 [1] : vector<16x32xf32> to vector<16xf32>
    %217 = vector.shape_cast %216 : vector<16xf32> to vector<16x1xf32>
    %218 = arith.mulf %213, %213 : vector<16x32xf32>
    %cst_74 = arith.constant dense<0.000000e+00> : vector<16xf32>
    %219 = vector.multi_reduction <add>, %218, %cst_74 [1] : vector<16x32xf32> to vector<16xf32>
    %220 = vector.shape_cast %219 : vector<16xf32> to vector<16x1xf32>
    %cst_75 = arith.constant 3.125000e-02 : f32
    %221 = vector.broadcast %cst_75 : f32 to vector<16x1xf32>
    %222 = arith.mulf %217, %221 : vector<16x1xf32>
    %cst_76 = arith.constant 3.125000e-02 : f32
    %223 = vector.broadcast %cst_76 : f32 to vector<16x1xf32>
    %224 = arith.mulf %220, %223 : vector<16x1xf32>
    %225 = arith.mulf %222, %222 : vector<16x1xf32>
    %226 = arith.subf %224, %225 : vector<16x1xf32>
    %227 = vector.broadcast %222 : vector<16x1xf32> to vector<16x32xf32>
    %228 = arith.subf %213, %227 : vector<16x32xf32>
    %cst_77 = arith.constant 9.99999974E-6 : f32
    %229 = vector.broadcast %cst_77 : f32 to vector<16x1xf32>
    %230 = arith.addf %226, %229 : vector<16x1xf32>
    %231 = math.rsqrt %230 : vector<16x1xf32>
    %232 = vector.broadcast %231 : vector<16x1xf32> to vector<16x32xf32>
    %233 = arith.mulf %228, %232 : vector<16x32xf32>
    %234 = vector.broadcast %214 : vector<1x32xf32> to vector<16x32xf32>
    %235 = arith.mulf %233, %234 : vector<16x32xf32>
    %236 = vector.broadcast %215 : vector<1x32xf32> to vector<16x32xf32>
    %237 = arith.addf %235, %236 : vector<16x32xf32>
    %238 = arith.truncf %237 : vector<16x32xf32> to vector<16x32xbf16>
    %c400 = arith.constant 400 : index
    %c0_78 = arith.constant 0 : index
    %239 = vector.load %arg2[%c400, %c0_78] : memref<672x32xbf16, #tpu.memory_space<vmem>>, vector<96x32xbf16>
    %cst_79 = arith.constant dense<0.000000e+00> : vector<16x96xf32>
    %240 = tpu.matmul %238, %239, %cst_79 {dimension_numbers = #tpu.dot_dimension_numbers<[1], [1], [0], [0], [0, 0, 1, 0], [], []>} : vector<16x32xbf16>, vector<96x32xbf16>, vector<16x96xf32> -> vector<16x96xf32>
    %241 = vector.extract_strided_slice %240 {offsets = [0, 0], sizes = [16, 32], strides = [1, 1]} : vector<16x96xf32> to vector<16x32xf32>
    %c21 = arith.constant 21 : index
    %c0_80 = arith.constant 0 : index
    %242 = vector.load %arg3[%c21, %c0_80] : memref<40x32xf32, #tpu.memory_space<vmem>>, vector<1x32xf32>
    %243 = vector.broadcast %242 : vector<1x32xf32> to vector<16x32xf32>
    %244 = arith.addf %241, %243 : vector<16x32xf32>
    %245 = arith.truncf %244 : vector<16x32xf32> to vector<16x32xbf16>
    %246 = vector.extract_strided_slice %240 {offsets = [0, 32], sizes = [16, 32], strides = [1, 1]} : vector<16x96xf32> to vector<16x32xf32>
    %c22 = arith.constant 22 : index
    %c0_81 = arith.constant 0 : index
    %247 = vector.load %arg3[%c22, %c0_81] : memref<40x32xf32, #tpu.memory_space<vmem>>, vector<1x32xf32>
    %248 = vector.broadcast %247 : vector<1x32xf32> to vector<16x32xf32>
    %249 = arith.addf %246, %248 : vector<16x32xf32>
    %250 = arith.truncf %249 : vector<16x32xf32> to vector<16x32xbf16>
    %251 = vector.extract_strided_slice %240 {offsets = [0, 64], sizes = [16, 32], strides = [1, 1]} : vector<16x96xf32> to vector<16x32xf32>
    %c23 = arith.constant 23 : index
    %c0_82 = arith.constant 0 : index
    %252 = vector.load %arg3[%c23, %c0_82] : memref<40x32xf32, #tpu.memory_space<vmem>>, vector<1x32xf32>
    %253 = vector.broadcast %252 : vector<1x32xf32> to vector<16x32xf32>
    %254 = arith.addf %251, %253 : vector<16x32xf32>
    %255 = arith.truncf %254 : vector<16x32xf32> to vector<16x32xbf16>
    %256 = vector.extract_strided_slice %245 {offsets = [0, 0], sizes = [16, 16], strides = [1, 1]} : vector<16x32xbf16> to vector<16x16xbf16>
    %257 = vector.extract_strided_slice %250 {offsets = [0, 0], sizes = [16, 16], strides = [1, 1]} : vector<16x32xbf16> to vector<16x16xbf16>
    %cst_83 = arith.constant dense<0.000000e+00> : vector<16x16xf32>
    %258 = tpu.matmul %256, %257, %cst_83 {dimension_numbers = #tpu.dot_dimension_numbers<[1], [1], [0], [0], [0, 0, 1, 0], [], []>} : vector<16x16xbf16>, vector<16x16xbf16>, vector<16x16xf32> -> vector<16x16xf32>
    %259 = math.exp %258 : vector<16x16xf32>
    %260 = arith.mulf %259, %0 : vector<16x16xf32>
    %cst_84 = arith.constant dense<0.000000e+00> : vector<16xf32>
    %261 = vector.multi_reduction <add>, %260, %cst_84 [1] : vector<16x16xf32> to vector<16xf32>
    %262 = vector.shape_cast %261 : vector<16xf32> to vector<16x1xf32>
    %263 = tpu.reciprocal %262 {approx = true} : vector<16x1xf32> -> vector<16x1xf32>
    %264 = vector.broadcast %263 : vector<16x1xf32> to vector<16x16xf32>
    %265 = arith.mulf %260, %264 : vector<16x16xf32>
    %266 = arith.truncf %265 : vector<16x16xf32> to vector<16x16xbf16>
    %267 = vector.extract_strided_slice %255 {offsets = [0, 0], sizes = [16, 16], strides = [1, 1]} : vector<16x32xbf16> to vector<16x16xbf16>
    %cst_85 = arith.constant dense<0.000000e+00> : vector<16x16xf32>
    %268 = tpu.matmul %266, %267, %cst_85 {dimension_numbers = #tpu.dot_dimension_numbers<[1], [0], [0], [1], [0, 0, 1, 1], [], []>} : vector<16x16xbf16>, vector<16x16xbf16>, vector<16x16xf32> -> vector<16x16xf32>
    %269 = vector.extract_strided_slice %245 {offsets = [0, 16], sizes = [16, 16], strides = [1, 1]} : vector<16x32xbf16> to vector<16x16xbf16>
    %270 = vector.extract_strided_slice %250 {offsets = [0, 16], sizes = [16, 16], strides = [1, 1]} : vector<16x32xbf16> to vector<16x16xbf16>
    %cst_86 = arith.constant dense<0.000000e+00> : vector<16x16xf32>
    %271 = tpu.matmul %269, %270, %cst_86 {dimension_numbers = #tpu.dot_dimension_numbers<[1], [1], [0], [0], [0, 0, 1, 0], [], []>} : vector<16x16xbf16>, vector<16x16xbf16>, vector<16x16xf32> -> vector<16x16xf32>
    %272 = math.exp %271 : vector<16x16xf32>
    %273 = arith.mulf %272, %0 : vector<16x16xf32>
    %cst_87 = arith.constant dense<0.000000e+00> : vector<16xf32>
    %274 = vector.multi_reduction <add>, %273, %cst_87 [1] : vector<16x16xf32> to vector<16xf32>
    %275 = vector.shape_cast %274 : vector<16xf32> to vector<16x1xf32>
    %276 = tpu.reciprocal %275 {approx = true} : vector<16x1xf32> -> vector<16x1xf32>
    %277 = vector.broadcast %276 : vector<16x1xf32> to vector<16x16xf32>
    %278 = arith.mulf %273, %277 : vector<16x16xf32>
    %279 = arith.truncf %278 : vector<16x16xf32> to vector<16x16xbf16>
    %280 = vector.extract_strided_slice %255 {offsets = [0, 16], sizes = [16, 16], strides = [1, 1]} : vector<16x32xbf16> to vector<16x16xbf16>
    %cst_88 = arith.constant dense<0.000000e+00> : vector<16x16xf32>
    %281 = tpu.matmul %279, %280, %cst_88 {dimension_numbers = #tpu.dot_dimension_numbers<[1], [0], [0], [1], [0, 0, 1, 1], [], []>} : vector<16x16xbf16>, vector<16x16xbf16>, vector<16x16xf32> -> vector<16x16xf32>
    %282 = tpu.concatenate %268, %281 in 1 : vector<16x16xf32>, vector<16x16xf32> -> vector<16x32xf32>
    %283 = arith.truncf %282 : vector<16x32xf32> to vector<16x32xbf16>
    %c496 = arith.constant 496 : index
    %c0_89 = arith.constant 0 : index
    %284 = vector.load %arg2[%c496, %c0_89] : memref<672x32xbf16, #tpu.memory_space<vmem>>, vector<32x32xbf16>
    %cst_90 = arith.constant dense<0.000000e+00> : vector<16x32xf32>
    %285 = tpu.matmul %283, %284, %cst_90 {dimension_numbers = #tpu.dot_dimension_numbers<[1], [0], [0], [1], [0, 0, 1, 1], [], []>} : vector<16x32xbf16>, vector<32x32xbf16>, vector<16x32xf32> -> vector<16x32xf32>
    %c24 = arith.constant 24 : index
    %c0_91 = arith.constant 0 : index
    %286 = vector.load %arg3[%c24, %c0_91] : memref<40x32xf32, #tpu.memory_space<vmem>>, vector<1x32xf32>
    %287 = vector.broadcast %286 : vector<1x32xf32> to vector<16x32xf32>
    %288 = arith.addf %285, %287 : vector<16x32xf32>
    %289 = arith.addf %237, %288 : vector<16x32xf32>
    %c27 = arith.constant 27 : index
    %c0_92 = arith.constant 0 : index
    %290 = vector.load %arg3[%c27, %c0_92] : memref<40x32xf32, #tpu.memory_space<vmem>>, vector<1x32xf32>
    %c28 = arith.constant 28 : index
    %c0_93 = arith.constant 0 : index
    %291 = vector.load %arg3[%c28, %c0_93] : memref<40x32xf32, #tpu.memory_space<vmem>>, vector<1x32xf32>
    %cst_94 = arith.constant dense<0.000000e+00> : vector<16xf32>
    %292 = vector.multi_reduction <add>, %289, %cst_94 [1] : vector<16x32xf32> to vector<16xf32>
    %293 = vector.shape_cast %292 : vector<16xf32> to vector<16x1xf32>
    %294 = arith.mulf %289, %289 : vector<16x32xf32>
    %cst_95 = arith.constant dense<0.000000e+00> : vector<16xf32>
    %295 = vector.multi_reduction <add>, %294, %cst_95 [1] : vector<16x32xf32> to vector<16xf32>
    %296 = vector.shape_cast %295 : vector<16xf32> to vector<16x1xf32>
    %cst_96 = arith.constant 3.125000e-02 : f32
    %297 = vector.broadcast %cst_96 : f32 to vector<16x1xf32>
    %298 = arith.mulf %293, %297 : vector<16x1xf32>
    %cst_97 = arith.constant 3.125000e-02 : f32
    %299 = vector.broadcast %cst_97 : f32 to vector<16x1xf32>
    %300 = arith.mulf %296, %299 : vector<16x1xf32>
    %301 = arith.mulf %298, %298 : vector<16x1xf32>
    %302 = arith.subf %300, %301 : vector<16x1xf32>
    %303 = vector.broadcast %298 : vector<16x1xf32> to vector<16x32xf32>
    %304 = arith.subf %289, %303 : vector<16x32xf32>
    %cst_98 = arith.constant 9.99999974E-6 : f32
    %305 = vector.broadcast %cst_98 : f32 to vector<16x1xf32>
    %306 = arith.addf %302, %305 : vector<16x1xf32>
    %307 = math.rsqrt %306 : vector<16x1xf32>
    %308 = vector.broadcast %307 : vector<16x1xf32> to vector<16x32xf32>
    %309 = arith.mulf %304, %308 : vector<16x32xf32>
    %310 = vector.broadcast %290 : vector<1x32xf32> to vector<16x32xf32>
    %311 = arith.mulf %309, %310 : vector<16x32xf32>
    %312 = vector.broadcast %291 : vector<1x32xf32> to vector<16x32xf32>
    %313 = arith.addf %311, %312 : vector<16x32xf32>
    %314 = arith.truncf %313 : vector<16x32xf32> to vector<16x32xbf16>
    %c528 = arith.constant 528 : index
    %c0_99 = arith.constant 0 : index
    %315 = vector.load %arg2[%c528, %c0_99] : memref<672x32xbf16, #tpu.memory_space<vmem>>, vector<32x32xbf16>
    %cst_100 = arith.constant dense<0.000000e+00> : vector<16x32xf32>
    %316 = tpu.matmul %314, %315, %cst_100 {dimension_numbers = #tpu.dot_dimension_numbers<[1], [0], [0], [1], [0, 0, 1, 1], [], []>} : vector<16x32xbf16>, vector<32x32xbf16>, vector<16x32xf32> -> vector<16x32xf32>
    %c25 = arith.constant 25 : index
    %c0_101 = arith.constant 0 : index
    %317 = vector.load %arg3[%c25, %c0_101] : memref<40x32xf32, #tpu.memory_space<vmem>>, vector<1x32xf32>
    %318 = vector.broadcast %317 : vector<1x32xf32> to vector<16x32xf32>
    %319 = arith.addf %316, %318 : vector<16x32xf32>
    %cst_102 = arith.constant 0.000000e+00 : f32
    %320 = vector.broadcast %cst_102 : f32 to vector<16x32xf32>
    %321 = arith.maximumf %319, %320 : vector<16x32xf32>
    %322 = arith.truncf %321 : vector<16x32xf32> to vector<16x32xbf16>
    %c560 = arith.constant 560 : index
    %c0_103 = arith.constant 0 : index
    %323 = vector.load %arg2[%c560, %c0_103] : memref<672x32xbf16, #tpu.memory_space<vmem>>, vector<32x32xbf16>
    %cst_104 = arith.constant dense<0.000000e+00> : vector<16x32xf32>
    %324 = tpu.matmul %322, %323, %cst_104 {dimension_numbers = #tpu.dot_dimension_numbers<[1], [0], [0], [1], [0, 0, 1, 1], [], []>} : vector<16x32xbf16>, vector<32x32xbf16>, vector<16x32xf32> -> vector<16x32xf32>
    %c26 = arith.constant 26 : index
    %c0_105 = arith.constant 0 : index
    %325 = vector.load %arg3[%c26, %c0_105] : memref<40x32xf32, #tpu.memory_space<vmem>>, vector<1x32xf32>
    %326 = vector.broadcast %325 : vector<1x32xf32> to vector<16x32xf32>
    %327 = arith.addf %324, %326 : vector<16x32xf32>
    %328 = arith.addf %313, %327 : vector<16x32xf32>
    %c29 = arith.constant 29 : index
    %c0_106 = arith.constant 0 : index
    %329 = vector.load %arg3[%c29, %c0_106] : memref<40x32xf32, #tpu.memory_space<vmem>>, vector<1x32xf32>
    %c30 = arith.constant 30 : index
    %c0_107 = arith.constant 0 : index
    %330 = vector.load %arg3[%c30, %c0_107] : memref<40x32xf32, #tpu.memory_space<vmem>>, vector<1x32xf32>
    %cst_108 = arith.constant dense<0.000000e+00> : vector<16xf32>
    %331 = vector.multi_reduction <add>, %328, %cst_108 [1] : vector<16x32xf32> to vector<16xf32>
    %332 = vector.shape_cast %331 : vector<16xf32> to vector<16x1xf32>
    %333 = arith.mulf %328, %328 : vector<16x32xf32>
    %cst_109 = arith.constant dense<0.000000e+00> : vector<16xf32>
    %334 = vector.multi_reduction <add>, %333, %cst_109 [1] : vector<16x32xf32> to vector<16xf32>
    %335 = vector.shape_cast %334 : vector<16xf32> to vector<16x1xf32>
    %cst_110 = arith.constant 3.125000e-02 : f32
    %336 = vector.broadcast %cst_110 : f32 to vector<16x1xf32>
    %337 = arith.mulf %332, %336 : vector<16x1xf32>
    %cst_111 = arith.constant 3.125000e-02 : f32
    %338 = vector.broadcast %cst_111 : f32 to vector<16x1xf32>
    %339 = arith.mulf %335, %338 : vector<16x1xf32>
    %340 = arith.mulf %337, %337 : vector<16x1xf32>
    %341 = arith.subf %339, %340 : vector<16x1xf32>
    %342 = vector.broadcast %337 : vector<16x1xf32> to vector<16x32xf32>
    %343 = arith.subf %328, %342 : vector<16x32xf32>
    %cst_112 = arith.constant 9.99999974E-6 : f32
    %344 = vector.broadcast %cst_112 : f32 to vector<16x1xf32>
    %345 = arith.addf %341, %344 : vector<16x1xf32>
    %346 = math.rsqrt %345 : vector<16x1xf32>
    %347 = vector.broadcast %346 : vector<16x1xf32> to vector<16x32xf32>
    %348 = arith.mulf %343, %347 : vector<16x32xf32>
    %349 = vector.broadcast %329 : vector<1x32xf32> to vector<16x32xf32>
    %350 = arith.mulf %348, %349 : vector<16x32xf32>
    %351 = vector.broadcast %330 : vector<1x32xf32> to vector<16x32xf32>
    %352 = arith.addf %350, %351 : vector<16x32xf32>
    %353 = arith.truncf %352 : vector<16x32xf32> to vector<16x32xbf16>
    %c592 = arith.constant 592 : index
    %c0_113 = arith.constant 0 : index
    %354 = vector.load %arg2[%c592, %c0_113] : memref<672x32xbf16, #tpu.memory_space<vmem>>, vector<32x32xbf16>
    %cst_114 = arith.constant dense<0.000000e+00> : vector<16x32xf32>
    %355 = tpu.matmul %353, %354, %cst_114 {dimension_numbers = #tpu.dot_dimension_numbers<[1], [0], [0], [1], [0, 0, 1, 1], [], []>} : vector<16x32xbf16>, vector<32x32xbf16>, vector<16x32xf32> -> vector<16x32xf32>
    %c31 = arith.constant 31 : index
    %c0_115 = arith.constant 0 : index
    %356 = vector.load %arg3[%c31, %c0_115] : memref<40x32xf32, #tpu.memory_space<vmem>>, vector<1x32xf32>
    %357 = vector.broadcast %356 : vector<1x32xf32> to vector<16x32xf32>
    %358 = arith.addf %355, %357 : vector<16x32xf32>
    %cst_116 = arith.constant 0.000000e+00 : f32
    %359 = vector.broadcast %cst_116 : f32 to vector<16x32xf32>
    %360 = arith.maximumf %358, %359 : vector<16x32xf32>
    %361 = arith.truncf %360 : vector<16x32xf32> to vector<16x32xbf16>
    %c624 = arith.constant 624 : index
    %c0_117 = arith.constant 0 : index
    %362 = vector.load %arg2[%c624, %c0_117] : memref<672x32xbf16, #tpu.memory_space<vmem>>, vector<32x32xbf16>
    %cst_118 = arith.constant dense<0.000000e+00> : vector<16x32xf32>
    %363 = tpu.matmul %361, %362, %cst_118 {dimension_numbers = #tpu.dot_dimension_numbers<[1], [0], [0], [1], [0, 0, 1, 1], [], []>} : vector<16x32xbf16>, vector<32x32xbf16>, vector<16x32xf32> -> vector<16x32xf32>
    %c32 = arith.constant 32 : index
    %c0_119 = arith.constant 0 : index
    %364 = vector.load %arg3[%c32, %c0_119] : memref<40x32xf32, #tpu.memory_space<vmem>>, vector<1x32xf32>
    %365 = vector.broadcast %364 : vector<1x32xf32> to vector<16x32xf32>
    %366 = arith.addf %363, %365 : vector<16x32xf32>
    %cst_120 = arith.constant 0.000000e+00 : f32
    %367 = vector.broadcast %cst_120 : f32 to vector<16x32xf32>
    %368 = arith.maximumf %366, %367 : vector<16x32xf32>
    %c656 = arith.constant 656 : index
    %c0_121 = arith.constant 0 : index
    %369 = vector.load %arg2[%c656, %c0_121] : memref<672x32xbf16, #tpu.memory_space<vmem>>, vector<16x32xbf16>
    %370 = arith.truncf %368 : vector<16x32xf32> to vector<16x32xbf16>
    %cst_122 = arith.constant dense<0.000000e+00> : vector<16x16xf32>
    %371 = tpu.matmul %369, %370, %cst_122 {dimension_numbers = #tpu.dot_dimension_numbers<[1], [1], [0], [0], [0, 0, 1, 0], [], []>} : vector<16x32xbf16>, vector<16x32xbf16>, vector<16x16xf32> -> vector<16x16xf32>
    %372 = vector.extract_strided_slice %371 {offsets = [0, 0], sizes = [1, 16], strides = [1, 1]} : vector<16x16xf32> to vector<1x16xf32>
    %c33 = arith.constant 33 : index
    %c0_123 = arith.constant 0 : index
    %373 = vector.load %arg3[%c33, %c0_123] : memref<40x32xf32, #tpu.memory_space<vmem>>, vector<1x1xf32>
    %374 = vector.broadcast %373 : vector<1x1xf32> to vector<1x16xf32>
    %375 = arith.addf %372, %374 : vector<1x16xf32>
    %cst_124 = arith.constant 0.000000e+00 : f32
    %376 = vector.broadcast %cst_124 : f32 to vector<1x16xf32>
    %377 = arith.subf %376, %375 : vector<1x16xf32>
    %378 = math.exp %377 : vector<1x16xf32>
    %cst_125 = arith.constant 1.000000e+00 : f32
    %379 = vector.broadcast %cst_125 : f32 to vector<1x16xf32>
    %380 = arith.addf %379, %378 : vector<1x16xf32>
    %cst_126 = arith.constant 1.000000e+00 : f32
    %381 = vector.broadcast %cst_126 : f32 to vector<1x16xf32>
    %382 = arith.divf %381, %380 : vector<1x16xf32>
    %cst_127 = arith.constant dense<0xFF800000> : vector<1xf32>
    %383 = vector.multi_reduction <maximumf>, %382, %cst_127 [1] : vector<1x16xf32> to vector<1xf32>
    %384 = vector.shape_cast %383 : vector<1xf32> to vector<1x1xf32>
    %385 = vector.broadcast %384 : vector<1x1xf32> to vector<1x16xf32>
    %386 = arith.divf %382, %385 : vector<1x16xf32>
    %c0_128 = arith.constant 0 : index
    %c0_129 = arith.constant 0 : index
    %387 = vector.load %arg5[%c0_128, %c0_129] : memref<1x16xf32, #tpu.memory_space<vmem>>, vector<1x16xf32>
    tpu.vector_store %arg5[%c0_128, %c0_129], %386 {strides = array<i32>} : memref<1x16xf32, #tpu.memory_space<vmem>>, vector<1x16xf32>,
    return
  }
  func.func @transform_0(%arg0: i32) -> (i32, i32) {
    %c0_i32 = arith.constant 0 : i32
    %c0_i32_0 = arith.constant 0 : i32
    %c0_i32_1 = arith.constant 0 : i32
    return %c0_i32, %c0_i32_0 : i32, i32
  }
  func.func @transform_1(%arg0: i32) -> (i32, i32) {
    %c0_i32 = arith.constant 0 : i32
    %c0_i32_0 = arith.constant 0 : i32
    %c0_i32_1 = arith.constant 0 : i32
    return %c0_i32, %c0_i32_0 : i32, i32
  }
  func.func @transform_2(%arg0: i32) -> (i32, i32) {
    %c0_i32 = arith.constant 0 : i32
    %c0_i32_0 = arith.constant 0 : i32
    %c0_i32_1 = arith.constant 0 : i32
    return %c0_i32, %c0_i32_0 : i32, i32
  }
  func.func @transform_3(%arg0: i32) -> (i32, i32) {
    %c0_i32 = arith.constant 0 : i32
    %c0_i32_0 = arith.constant 0 : i32
    %c0_i32_1 = arith.constant 0 : i32
    return %c0_i32, %c0_i32_0 : i32, i32
  }
  func.func @transform_4(%arg0: i32) -> (i32, i32) {
    %c0_i32 = arith.constant 0 : i32
    %c0_i32_0 = arith.constant 0 : i32
    %c0_i32_1 = arith.constant 0 : i32
    return %c0_i32, %c0_i32_0 : i32, i32
  }
}

</mosaic_0001>

<bundles_post_ra>
// kernel: tpu_custom_call.1
= control target key start
LH: loop header
LB: loop body
LE: loop exit
PB: predicated region body
PF: predicated region fallthrough
CT: control target
= control target key end

     0   :  { %vm34_vm0 = vcmask 1042432   ;;  %v2892_v2 = vmov 0.0   ;;  %vm2893_vm1 = vmmov 0   ;;  %vm30_vm2 = vcmask 48128   ;;  %s3462_s0 = inlined_call_operand.vmem [shape: f32[16,6], index: 0, kind: input, shape index: {}]   ;;  %s3463_s1 = inlined_call_operand.vmem [shape: bf16[672,32], index: 1, kind: input, shape index: {}]   ;;  %s3464_s2 = inlined_call_operand.vmem [shape: f32[40,32], index: 2, kind: input, shape index: {}]   ;;  %s3465_s3 = inlined_call_operand.vmem [shape: f32[16,16], index: 3, kind: input, shape index: {}]   ;;  %s3466_s4 = inlined_call_operand.hbm [shape: f32[1,16], index: 4, kind: output, shape index: {}]  }
   0x1   :  { %v24_v0 = vld [vmem:[%s3463_s1] sm:$0x7]  ;;  %2499 = vmatprep.subr.bf16.mxu0 %v2892_v2  ;;  %2501 = vmatprep.mubr.msk.bf16.mxu0 %vm2893_vm1, %v2892_v2  ;;  %v22_v4 = vld [vmem:[%s3462_s0 + $0x8] sm:$0xff]  ;;  %vm122_vm3 = vcmask 261120   ;;  %v2748_v7 = vld [vmem:[%s3463_s1 + $0x10] sm:$0xff]  }
   0x2   :  { %v21_v1 = vld [vmem:[%s3462_s0] sm:$0xff]  ;;  %v36_v3 = vsel %vm34_vm0, %v24_v0, 0  ;;  %v2747_v5 = vld [vmem:[%s3463_s1 + $0x8] sm:$0xff]   ;;  %2505 = vmatprep.subr.bf16.mxu1 %v2892_v2  ;;  %v2749_v9 = vld [vmem:[%s3463_s1 + $0x18] sm:$0xff]   ;;  %2517 = vmatprep.mubr.msk.bf16.mxu1 %vm2893_vm1, %v2892_v2  ;;  %v130_v11 = vsel %vm122_vm3, %v2748_v7, 0 }
   0x3   :  { %2500 = vmatpush3.bf16.msra.mxu0 %v36_v3  ;;  %v23_v6 = vpack.c.bf16 %v22_v4, %v21_v1  ;;  %v127_v8 = vsel %vm122_vm3, %v2747_v5, 0  ;;  %v2750_v10 = vld [vmem:[%s3463_s1 + $0x20] sm:$0xff]   ;;  %v133_v12 = vsel %vm122_vm3, %v2749_v9, 0  ;;  %v2751_v14 = vld [vmem:[%s3463_s1 + $0x28] sm:$0xff]  }
   0x4   :  { %2521 = vmatprep.subr.bf16.mxu0 %v2892_v2  ;;  %2506 = vmatpush3.bf16.xpose.msra.mxu1 %v127_v8  ;;  %v136_v13 = vsel %vm122_vm3, %v2750_v10, 0 }
   0x5   :  { %2507 = vmatprep.subr.bf16.mxu1 %v2892_v2 }
   0x6   :  { %2502 = vmatmul.mubr.msk.bf16.vlgmr.msra.gmra.mrb[0].mxu0 %vm30_vm2, %v23_v6 }
   0x7   :  { %2523 = vmatprep.mubr.msk.bf16.mxu0 %vm2893_vm1, %v2892_v2 }
   0xc   :  { %2508 = vmatpush3.bf16.xpose.msra.mxu1 %v130_v11 }
   0xd   :  { %2509 = vmatprep.subr.bf16.mxu1 %v2892_v2 }
  0x14   :  { %2510 = vmatpush3.bf16.xpose.msra.mxu1 %v133_v12 }
  0x15   :  { %2511 = vmatprep.subr.bf16.mxu1 %v2892_v2 }
  0x1c   :  { %2512 = vmatpush3.bf16.xpose.msra.mxu1 %v136_v13 }
  0x1d   :  { %2513 = vmatprep.subr.bf16.mxu1 %v2892_v2 }
  0x1e   :  { %9 = vsyncpa [#allocation3], 0  ;;  %v139_v15 = vsel %vm122_vm3, %v2751_v14, 0  ;;  %v2752_v16 = vld [vmem:[%s3463_s1 + $0x30] sm:$0xff]   ;;  %v2326_v18 = vld [vmem:[%s3464_s2 + $0x3] ss:$0 sm:$0xff] }
  0x1f   :  { %v142_v17 = vsel %vm122_vm3, %v2752_v16, 0  ;;  %v2325_v19 = vld [vmem:[%s3464_s2 + $0x2] ss:$0 sm:$0xff]  ;;  %s2894_s10 = smov 64   ;;  %s2895_s11 = smov 32   ;;  %vm220_vm4 = vcmask 130048  }
  0x20   :  { %211 = vrot.lane.b32.xlu1 %v2326_v18, %s2894_s10  ;;  %199 = vrot.lane.b32.xlu0 %v2325_v19, %s2895_s11  ;;  %v2315_v20 = vld [vmem:[%s3464_s2] ss:$0 sm:$0xff]  ;;  %v2324_v29 = vld [vmem:[%s3464_s2 + $0x1] ss:$0 sm:$0xff]  ;;  %s2896_s16 = smov 96   ;;  %s2897_s21 = smov 80  }
  0x21   :  { %v3010_v52 = vld [vmem:[%s3465_s3] sm:$0xff]  ;;  %v3015_v54 = vld [vmem:[%s3465_s3 + $0x8] sm:$0xff]  ;;  %s2898_s22 = smov 112   ;;  %s2899_s23 = smov 48   ;;  %vm2294_vm5 = vcmask 122880  }
  0x22   :  { %s2900_s27 = smov 16  }
  0x24   :  { %2514 = vmatpush3.bf16.xpose.msra.mxu1 %v139_v15 }
  0x25   :  { %2515 = vmatprep.subr.bf16.mxu1 %v2892_v2 }
  0x2c   :  { %2516 = vmatpush3.bf16.xpose.msra.mxu1 %v142_v17 }
  0x2d   :  { %2561 = vmatprep.subr.bf16.mxu1 %v2892_v2 }
  0x92   :  { %v200_v28 = vpop.permute.xlu0 %199  ;;  %v212_v30 = vpop.permute.xlu1 %211 }
  0xd9   :  { %v72_v21 = vpop.f32.mrb[0].mxu0 }
  0xda   :  { %v2503_v22 = vpop.f32.mrb[1].mxu0  ;;  %v2987_v24 = vadd.f32 %v2315_v20, %v72_v21 }
  0xdb   :  { %v75_v23 = vpop.f32.mrb[2].mxu0 }
  0xdc   :  { %v2989_v25 = vadd.f32 %v2315_v20, %v75_v23  ;;  %v2504_v26 = vpop.f32.mrb[3].mxu0 }
  0xde   :  { %v79_v27 = vpack.c.bf16 %v2989_v25, %v2987_v24 }
  0xe0   :  { %2518 = vmatmul.mubr.msk.bf16.vlgmr.msra.gmra.mrb[0].mxu1 %vm122_vm3, %v79_v27 }
  0xe1   :  { %2565 = vmatprep.mubr.msk.bf16.mxu1 %vm2893_vm1, %v2892_v2 }
 0x1b3   :  { %v178_v31 = vpop.f32.mrb[0].mxu1 }
 0x1b4   :  { %v2519_v32 = vpop.f32.mrb[1].mxu1  ;;  %v190_v33 = vadd.f32 %v2324_v29, %v178_v31  ;;  %v202_v34 = vadd.f32 %v200_v28, %v178_v31  ;;  %v214_v36 = vadd.f32 %v212_v30, %v178_v31 }
 0x1b5   :  { %v181_v35 = vpop.f32.mrb[2].mxu1 }
 0x1b6   :  { %v191_v37 = vadd.f32 %v2324_v29, %v181_v35  ;;  %v203_v38 = vadd.f32 %v200_v28, %v181_v35  ;;  %v215_v39 = vadd.f32 %v212_v30, %v181_v35  ;;  %v2520_v40 = vpop.f32.mrb[3].mxu1  ;;  %v2754_v35 = vld [vmem:[%s3463_s1 + $0x40] sm:$0xff]  }
 0x1b8   :  { %v192_v41 = vpack.c.bf16 %v191_v37, %v190_v33  ;;  %v204_v42 = vpack.c.bf16 %v203_v38, %v202_v34  ;;  %v2999_v43 = vpack.c.bf16 %v215_v39, %v214_v36  ;;  %v2753_v34 = vld [vmem:[%s3463_s1 + $0x38] sm:$0xff]  }
 0x1ba   :  { %218 = vrot.lane.b32.xlu0 %v204_v42, %s2896_s16 }
 0x22c   :  { %v219_v44 = vpop.permute.xlu0 %218 }
 0x22d   :  { %v225_v45 = vsel %vm220_vm4, %v219_v44, 0 }
 0x22e   :  { %2522 = vmatpush3.bf16.xpose.msra.mxu0 %v225_v45 }
 0x22f   :  { %2527 = vmatprep.subr.bf16.mxu0 %v2892_v2 }
 0x235   :  { %2524 = vmatmul.mubr.msk.bf16.vlgmr.msra.gmra.mrb[4].mxu0 %vm220_vm4, %v192_v41 }
 0x236   :  { %2529 = vmatprep.mubr.msk.bf16.mxu0 %vm2893_vm1, %v2892_v2 }
 0x308   :  { %v261_v46 = vpop.f32.mrb[4].mxu0 }
 0x309   :  { %v268_v47 = vmul.f32 1.442695, %v261_v46  ;;  %v2525_v48 = vpop.f32.mrb[5].mxu0 }
 0x30a   :  { %v264_v49 = vpop.f32.mrb[6].mxu0 }
 0x30b   :  { %2788 = vpow2.f32 %v268_v47  ;;  %v270_v50 = vmul.f32 1.442695, %v264_v49  ;;  %v2526_v51 = vpop.f32.mrb[7].mxu0  ;;  %v2331_v47 = vld [vmem:[%s3464_s2 + $0x4] ss:$0 sm:$0xff] }
 0x30d   :  { %2790 = vpow2.f32 %v270_v50 }
 0x315   :  { %v2789_v53 = vpop.eup %2788 }
 0x316   :  { %v272_v55 = vmul.f32 %v2789_v53, %v3010_v52 }
 0x317   :  { %v2791_v56 = vpop.eup %2790 }
 0x318   :  { %v274_v57 = vsel %vm220_vm4, %v272_v55, 0.0  ;;  %v273_v58 = vmul.f32 %v2791_v56, %v3015_v54 }
 0x319   :  { %275 = vadd.xlane.f32.xlu1 %v274_v57 }
 0x31a   :  { %v277_v59 = vsel %vm220_vm4, %v273_v58, 0.0 }
 0x31b   :  { %278 = vadd.xlane.f32.xlu0 %v277_v59 }
 0x32a   :  { %336 = vrot.lane.b32.xlu1 %v204_v42, %s2897_s21 }
 0x32e   :  { %334 = vrot.lane.b32.xlu1 %v192_v41, %s2898_s22 }
 0x331   :  { %286 = vrot.lane.b32.xlu0 %v2999_v43, %s2894_s10 }
 0x3a6   :  { %v276_v60 = vpop.xlane.xlu1 %275 }
 0x3a7   :  { %2792 = vrcp.f32 %v276_v60 }
 0x3a8   :  { %v279_v61 = vpop.xlane.xlu0 %278 }
 0x3a9   :  { %2794 = vrcp.f32 %v279_v61 }
 0x3aa   :  { %v337_v4 = vpop.permute.xlu1 %336 }
 0x3ab   :  { %v342_v6 = vsel %vm220_vm4, %v337_v4, 0 }
 0x3ac   :  { %v287_v62 = vpop.permute.xlu0 %286 }
 0x3ad   :  { %2528 = vmatpush3.bf16.msra.mxu0 %v287_v62 }
 0x3ae   :  { %2533 = vmatprep.subr.bf16.mxu0 %v2892_v2  ;;  %v335_v7 = vpop.permute.xlu1 %334 }
 0x3b1   :  { %v2793_v63 = vpop.eup %2792 }
 0x3b2   :  { %v282_v1 = vmul.f32 %v2793_v63, %v272_v55 }
 0x3b3   :  { %v2795_v0 = vpop.eup %2794 }
 0x3b4   :  { %v283_v3 = vmul.f32 %v2795_v0, %v273_v58 }
 0x3b6   :  { %v284_v5 = vpack.c.bf16 %v283_v3, %v282_v1 }
 0x3b8   :  { %2530 = vmatmul.mubr.msk.bf16.vlgmr.msra.gmra.mrb[8].mxu0 %vm220_vm4, %v284_v5 }
 0x3b9   :  { %2534 = vmatpush3.bf16.xpose.msra.mxu0 %v342_v6  ;;  %2535 = vmatprep.mubr.msk.bf16.mxu0 %vm2893_vm1, %v2892_v2 }
 0x3ba   :  { %2539 = vmatprep.subr.bf16.mxu0 %v2892_v2 }
 0x3c0   :  { %2536 = vmatmul.mubr.msk.bf16.vlgmr.msra.gmra.mrb[12].mxu0 %vm220_vm4, %v335_v7 }
 0x3c1   :  { %2541 = vmatprep.mubr.msk.bf16.mxu0 %vm2893_vm1, %v2892_v2 }
 0x48b   :  { %v326_v8 = vpop.f32.mrb[8].mxu0 }
 0x48c   :  { %v2531_v9 = vpop.f32.mrb[9].mxu0 }
 0x48d   :  { %v329_v10 = vpop.f32.mrb[10].mxu0 }
 0x48e   :  { %v2532_v11 = vpop.f32.mrb[11].mxu0 }
 0x493   :  { %v378_v12 = vpop.f32.mrb[12].mxu0 }
 0x494   :  { %v385_v13 = vmul.f32 1.442695, %v378_v12  ;;  %v2537_v14 = vpop.f32.mrb[13].mxu0 }
 0x495   :  { %v381_v15 = vpop.f32.mrb[14].mxu0 }
 0x496   :  { %2796 = vpow2.f32 %v385_v13  ;;  %v387_v16 = vmul.f32 1.442695, %v381_v15  ;;  %v2538_v17 = vpop.f32.mrb[15].mxu0 }
 0x498   :  { %2798 = vpow2.f32 %v387_v16 }
 0x4a0   :  { %v2797_v18 = vpop.eup %2796 }
 0x4a1   :  { %v389_v19 = vmul.f32 %v2797_v18, %v3010_v52  ;;  %v2335_v18 = vld [vmem:[%s3464_s2 + $0x7] ss:$0 sm:$0xff] }
 0x4a2   :  { %v2799_v20 = vpop.eup %2798 }
 0x4a3   :  { %v391_v21 = vsel %vm220_vm4, %v389_v19, 0.0  ;;  %v390_v22 = vmul.f32 %v2799_v20, %v3015_v54 }
 0x4a4   :  { %392 = vadd.xlane.f32.xlu0 %v391_v21 }
 0x4a5   :  { %v394_v23 = vsel %vm220_vm4, %v390_v22, 0.0 }
 0x4a6   :  { %395 = vadd.xlane.f32.xlu1 %v394_v23  ;;  %v2336_v23 = vld [vmem:[%s3464_s2 + $0x8] ss:$0 sm:$0xff] }
 0x4ba   :  { %402 = vrot.lane.b32.xlu0 %v2999_v43, %s2899_s23 }
 0x531   :  { %v393_v26 = vpop.xlane.xlu0 %392 }
 0x532   :  { %2800 = vrcp.f32 %v393_v26 }
 0x533   :  { %v396_v27 = vpop.xlane.xlu1 %395 }
 0x534   :  { %2802 = vrcp.f32 %v396_v27 }
 0x535   :  { %v403_v28 = vpop.permute.xlu0 %402 }
 0x536   :  { %2540 = vmatpush3.bf16.msra.mxu0 %v403_v28 }
 0x537   :  { %2545 = vmatprep.subr.bf16.mxu0 %v2892_v2 }
 0x53c   :  { %v2801_v29 = vpop.eup %2800 }
 0x53d   :  { %v399_v31 = vmul.f32 %v2801_v29, %v389_v19 }
 0x53e   :  { %v2803_v30 = vpop.eup %2802 }
 0x53f   :  { %v400_v32 = vmul.f32 %v2803_v30, %v390_v22  ;;  %v2757_v30 = vld [vmem:[%s3463_s1 + $0x58] sm:$0xff]  }
 0x540   :  { %2562 = vmatpush3.bf16.msra.mxu1 %v2757_v30 }
 0x541   :  { %v401_v33 = vpack.c.bf16 %v400_v32, %v399_v31  ;;  %2563 = vmatprep.subr.bf16.mxu1 %v2892_v2  ;;  %v2758_v31 = vld [vmem:[%s3463_s1 + $0x60] sm:$0xff]  }
 0x542   :  { %v2337_v32 = vld [vmem:[%s3464_s2 + $0x5] ss:$0 sm:$0xff] }
 0x543   :  { %2542 = vmatmul.mubr.msk.bf16.vlgmr.msra.gmra.mrb[16].mxu0 %vm220_vm4, %v401_v33 }
 0x544   :  { %2549 = vmatprep.mubr.msk.bf16.mxu0 %vm2893_vm1, %v2892_v2  ;;  %2546 = vmatpush3.bf16.msra.mxu0 %v2753_v34 }
 0x545   :  { %2547 = vmatprep.subr.bf16.mxu0 %v2892_v2  ;;  %2564 = vmatpush3.bf16.msra.mxu1 %v2758_v31 }
 0x546   :  { %2585 = vmatprep.subr.bf16.mxu1 %v2892_v2 }
 0x548   :  { %2548 = vmatpush3.bf16.msra.mxu0 %v2754_v35 }
 0x549   :  { %2553 = vmatprep.subr.bf16.mxu0 %v2892_v2 }
 0x616   :  { %v442_v36 = vpop.f32.mrb[16].mxu0 }
 0x617   :  { %v2543_v37 = vpop.f32.mrb[17].mxu0 }
 0x618   :  { %v445_v38 = vpop.f32.mrb[18].mxu0 }
 0x619   :  { %v2730_v39 = vpack.i.bf16 %v445_v38, %v442_v36  ;;  %v2544_v40 = vpop.f32.mrb[19].mxu0 }
 0x61b   :  { %2731 = vrot.lane.b32.xlu1 %v2730_v39, %s2900_s27 }
 0x68d   :  { %v2732_v41 = vpop.permute.xlu1 %2731 }
 0x68e   :  { %v2734_v42 = vunpack.i.h.bf16 %v2732_v41  ;;  %v2733_v43 = vunpack.i.l.bf16 %v2732_v41 }
 0x690   :  { %v458_v44 = vsel %vm220_vm4, %v329_v10, %v2734_v42  ;;  %v457_v45 = vsel %vm220_vm4, %v326_v8, %v2733_v43  ;;  %v2759_v42 = vld [vmem:[%s3463_s1 + $0x68] sm:$0xff]  }
 0x691   :  { %v459_v46 = vpack.c.bf16 %v458_v44, %v457_v45  ;;  %v798_v43 = vsel %vm122_vm3, %v2759_v42, 0  ;;  %v2760_v44 = vld [vmem:[%s3463_s1 + $0x70] sm:$0xff]  }
 0x692   :  { %v801_v45 = vsel %vm122_vm3, %v2760_v44, 0 }
 0x693   :  { %2550 = vmatmul.mubr.msk.bf16.vlgmr.msra.gmra.mrb[20].mxu0 %vm122_vm3, %v459_v46  ;;  %v2341_v46 = vld [vmem:[%s3464_s2 + $0x6] ss:$0 sm:$0xff] }
 0x694   :  { %2557 = vmatprep.mubr.msk.bf16.mxu0 %vm2893_vm1, %v2892_v2 }
 0x766   :  { %v518_v48 = vpop.f32.mrb[20].mxu0 }
 0x767   :  { %v519_v49 = vadd.f32 %v2331_v47, %v518_v48  ;;  %v2551_v50 = vpop.f32.mrb[21].mxu0 }
 0x768   :  { %v521_v51 = vpop.f32.mrb[22].mxu0 }
 0x769   :  { %v525_v53 = vadd.f32 %v519_v49, %v2987_v24  ;;  %v522_v55 = vadd.f32 %v2331_v47, %v521_v51  ;;  %v2552_v56 = vpop.f32.mrb[23].mxu0  ;;  %v2755_v24 = vld [vmem:[%s3463_s1 + $0x48] sm:$0xff]  }
 0x76a   :  { %2554 = vmatpush3.bf16.msra.mxu0 %v2755_v24 }
 0x76b   :  { %v526_v57 = vadd.f32 %v522_v55, %v2989_v25  ;;  %v529_v58 = vsel %vm122_vm3, %v525_v53, 0.0  ;;  %v535_v59 = vmul.f32 %v525_v53, %v525_v53  ;;  %v2756_v25 = vld [vmem:[%s3463_s1 + $0x50] sm:$0xff]   ;;  %2555 = vmatprep.subr.bf16.mxu0 %v2892_v2 }
 0x76c   :  { %530 = vadd.xlane.f32.xlu0 %v529_v58 }
 0x76d   :  { %v532_v60 = vsel %vm122_vm3, %v526_v57, 0.0  ;;  %v537_v61 = vsel %vm122_vm3, %v535_v59, 0.0  ;;  %v536_v62 = vmul.f32 %v526_v57, %v526_v57 }
 0x76e   :  { %533 = vadd.xlane.f32.xlu1 %v532_v60  ;;  %2556 = vmatpush3.bf16.msra.mxu0 %v2756_v25  ;;  %v2762_v25 = vld [vmem:[%s3463_s1 + $0x80] sm:$0xff]  }
 0x76f   :  { %v540_v63 = vsel %vm122_vm3, %v536_v62, 0.0  ;;  %2569 = vmatprep.subr.bf16.mxu0 %v2892_v2 }
 0x770   :  { %538 = vadd.xlane.f32.xlu0 %v537_v61 }
 0x774   :  { %541 = vadd.xlane.f32.xlu0 %v540_v63  ;;  %v2761_v63 = vld [vmem:[%s3463_s1 + $0x78] sm:$0xff]  }
 0x775   :  { %v804_v24 = vsel %vm122_vm3, %v2761_v63, 0 }
 0x7f9   :  { %v531_v0 = vpop.xlane.xlu0 %530 }
 0x7fa   :  { %v543_v1 = vmul.f32 0.03125, %v531_v0  ;;  %v807_v0 = vsel %vm122_vm3, %v2762_v25, 0 }
 0x7fb   :  { %v534_v3 = vpop.xlane.xlu1 %533 }
 0x7fc   :  { %v547_v5 = vmul.f32 %v543_v1, %v543_v1  ;;  %v544_v6 = vmul.f32 0.03125, %v534_v3  ;;  %v551_v15 = vsub.f32 %v525_v53, %v543_v1  ;;  %v2763_v1 = vld [vmem:[%s3463_s1 + $0x88] sm:$0xff]  }
 0x7fd   :  { %v539_v4 = vpop.xlane.xlu0 %538  ;;  %v810_v3 = vsel %vm122_vm3, %v2763_v1, 0 }
 0x7fe   :  { %v545_v7 = vmul.f32 0.03125, %v539_v4  ;;  %v548_v10 = vmul.f32 %v544_v6, %v544_v6  ;;  %v552_v19 = vsub.f32 %v526_v57, %v544_v6  ;;  %v2764_v4 = vld [vmem:[%s3463_s1 + $0x90] sm:$0xff]   ;;  %v2355_v6 = vld [vmem:[%s3464_s2 + $0xc] ss:$0 sm:$0xff] }
 0x800   :  { %v549_v8 = vsub.f32 %v545_v7, %v547_v5  ;;  %v813_v5 = vsel %vm122_vm3, %v2764_v4, 0  ;;  %v2356_v7 = vld [vmem:[%s3464_s2 + $0xd] ss:$0 sm:$0xff] }
 0x801   :  { %v542_v9 = vpop.xlane.xlu0 %541 }
 0x802   :  { %v553_v11 = vadd.f32 1e-05, %v549_v8  ;;  %v546_v12 = vmul.f32 0.03125, %v542_v9 }
 0x804   :  { %2804 = vrsqrt.f32 %v553_v11  ;;  %v550_v13 = vsub.f32 %v546_v12, %v548_v10 }
 0x806   :  { %v554_v14 = vadd.f32 1e-05, %v550_v13 }
 0x808   :  { %2806 = vrsqrt.f32 %v554_v14 }
 0x80e   :  { %v2805_v16 = vpop.eup %2804 }
 0x80f   :  { %v557_v17 = vmul.f32 %v2805_v16, %v551_v15 }
 0x811   :  { %v563_v22 = vmul.f32 %v2335_v18, %v557_v17 }
 0x812   :  { %v2807_v20 = vpop.eup %2806 }
 0x813   :  { %v558_v21 = vmul.f32 %v2807_v20, %v552_v19  ;;  %v569_v27 = vadd.f32 %v2336_v23, %v563_v22 }
 0x815   :  { %v564_v26 = vmul.f32 %v2335_v18, %v558_v21 }
 0x817   :  { %v570_v28 = vadd.f32 %v2336_v23, %v564_v26  ;;  %v2345_v26 = vld [vmem:[%s3464_s2 + $0x9] ss:$0 sm:$0xff] }
 0x819   :  { %v571_v29 = vpack.c.bf16 %v570_v28, %v569_v27 }
 0x81b   :  { %2558 = vmatmul.mubr.msk.bf16.vlgmr.msra.gmra.mrb[24].mxu0 %vm122_vm3, %v571_v29 }
 0x81c   :  { %2581 = vmatprep.mubr.msk.bf16.mxu0 %vm2893_vm1, %v2892_v2  ;;  %2570 = vmatpush3.bf16.xpose.msra.mxu0 %v798_v43 }
 0x81d   :  { %2571 = vmatprep.subr.bf16.mxu0 %v2892_v2 }
 0x824   :  { %2572 = vmatpush3.bf16.xpose.msra.mxu0 %v801_v45 }
 0x825   :  { %2573 = vmatprep.subr.bf16.mxu0 %v2892_v2 }
 0x82c   :  { %2574 = vmatpush3.bf16.xpose.msra.mxu0 %v804_v24 }
 0x82d   :  { %2575 = vmatprep.subr.bf16.mxu0 %v2892_v2 }
 0x834   :  { %2576 = vmatpush3.bf16.xpose.msra.mxu0 %v807_v0 }
 0x835   :  { %2577 = vmatprep.subr.bf16.mxu0 %v2892_v2 }
 0x83c   :  { %2578 = vmatpush3.bf16.xpose.msra.mxu0 %v810_v3 }
 0x83d   :  { %2579 = vmatprep.subr.bf16.mxu0 %v2892_v2 }
 0x844   :  { %2580 = vmatpush3.bf16.xpose.msra.mxu0 %v813_v5 }
 0x845   :  { %2625 = vmatprep.subr.bf16.mxu0 %v2892_v2 }
 0x8ee   :  { %v630_v33 = vpop.f32.mrb[24].mxu0 }
 0x8ef   :  { %v631_v34 = vadd.f32 %v2337_v32, %v630_v33  ;;  %v2559_v35 = vpop.f32.mrb[25].mxu0 }
 0x8f0   :  { %v633_v36 = vpop.f32.mrb[26].mxu0 }
 0x8f1   :  { %v634_v37 = vadd.f32 %v2337_v32, %v633_v36  ;;  %v2560_v38 = vpop.f32.mrb[27].mxu0  ;;  %v637_v39 = vmax.f32 %v631_v34, 0.0  ;;  %v2346_v32 = vld [vmem:[%s3464_s2 + $0xa] ss:$0 sm:$0xff] }
 0x8f2   :  { %v2354_v38 = vld [vmem:[%s3464_s2 + $0xb] ss:$0 sm:$0xff] }
 0x8f3   :  { %v638_v40 = vmax.f32 %v634_v37, 0.0 }
 0x8f5   :  { %v639_v41 = vpack.c.bf16 %v638_v40, %v637_v39 }
 0x8f7   :  { %2566 = vmatmul.mubr.msk.bf16.vlgmr.msra.gmra.mrb[4].mxu1 %vm122_vm3, %v639_v41 }
 0x8f8   :  { %2587 = vmatprep.mubr.msk.bf16.mxu1 %vm2893_vm1, %v2892_v2 }
 0x9ca   :  { %v698_v47 = vpop.f32.mrb[4].mxu1 }
 0x9cb   :  { %v699_v48 = vadd.f32 %v2341_v46, %v698_v47  ;;  %v2567_v49 = vpop.f32.mrb[5].mxu1 }
 0x9cc   :  { %v701_v50 = vpop.f32.mrb[6].mxu1 }
 0x9cd   :  { %v705_v51 = vadd.f32 %v699_v48, %v569_v27  ;;  %v702_v53 = vadd.f32 %v2341_v46, %v701_v50  ;;  %v2568_v55 = vpop.f32.mrb[7].mxu1 }
 0x9cf   :  { %v706_v56 = vadd.f32 %v702_v53, %v570_v28  ;;  %v709_v57 = vsel %vm122_vm3, %v705_v51, 0.0  ;;  %v715_v58 = vmul.f32 %v705_v51, %v705_v51 }
 0x9d0   :  { %710 = vadd.xlane.f32.xlu1 %v709_v57 }
 0x9d1   :  { %v712_v59 = vsel %vm122_vm3, %v706_v56, 0.0  ;;  %v716_v60 = vmul.f32 %v706_v56, %v706_v56  ;;  %v717_v61 = vsel %vm122_vm3, %v715_v58, 0.0 }
 0x9d2   :  { %713 = vadd.xlane.f32.xlu0 %v712_v59 }
 0x9d3   :  { %v720_v62 = vsel %vm122_vm3, %v716_v60, 0.0 }
 0x9d4   :  { %718 = vadd.xlane.f32.xlu1 %v717_v61 }
 0x9d6   :  { %721 = vadd.xlane.f32.xlu0 %v720_v62 }
 0x9e5   :  { %870 = vrot.lane.b32.xlu1 %v2355_v6, %s2895_s11 }
 0x9e9   :  { %882 = vrot.lane.b32.xlu1 %v2356_v7, %s2894_s10 }
 0xa5d   :  { %v711_v8 = vpop.xlane.xlu1 %710 }
 0xa5e   :  { %v723_v9 = vmul.f32 0.03125, %v711_v8 }
 0xa5f   :  { %v714_v10 = vpop.xlane.xlu0 %713 }
 0xa60   :  { %v724_v11 = vmul.f32 0.03125, %v714_v10  ;;  %v727_v13 = vmul.f32 %v723_v9, %v723_v9  ;;  %v731_v22 = vsub.f32 %v705_v51, %v723_v9 }
 0xa61   :  { %v719_v12 = vpop.xlane.xlu1 %718 }
 0xa62   :  { %v725_v14 = vmul.f32 0.03125, %v719_v12  ;;  %v728_v16 = vmul.f32 %v724_v11, %v724_v11  ;;  %v732_v27 = vsub.f32 %v706_v56, %v724_v11 }
 0xa63   :  { %v722_v15 = vpop.xlane.xlu0 %721 }
 0xa64   :  { %v729_v17 = vsub.f32 %v725_v14, %v727_v13  ;;  %v726_v18 = vmul.f32 0.03125, %v722_v15 }
 0xa65   :  { %v871_v37 = vpop.permute.xlu1 %870 }
 0xa66   :  { %v733_v19 = vadd.f32 1e-05, %v729_v17  ;;  %v730_v20 = vsub.f32 %v726_v18, %v728_v16 }
 0xa68   :  { %2808 = vrsqrt.f32 %v733_v19  ;;  %v734_v21 = vadd.f32 1e-05, %v730_v20 }
 0xa69   :  { %v883_v39 = vpop.permute.xlu1 %882 }
 0xa6a   :  { %2810 = vrsqrt.f32 %v734_v21 }
 0xa72   :  { %v2809_v23 = vpop.eup %2808 }
 0xa73   :  { %v737_v28 = vmul.f32 %v2809_v23, %v731_v22 }
 0xa74   :  { %v2811_v29 = vpop.eup %2810 }
 0xa75   :  { %v738_v30 = vmul.f32 %v2811_v29, %v732_v27  ;;  %v743_v31 = vmul.f32 %v2345_v26, %v737_v28 }
 0xa77   :  { %v744_v33 = vmul.f32 %v2345_v26, %v738_v30  ;;  %v3149_v34 = vadd.f32 %v2346_v32, %v743_v31 }
 0xa79   :  { %v3151_v35 = vadd.f32 %v2346_v32, %v744_v33 }
 0xa7b   :  { %v751_v36 = vpack.c.bf16 %v3151_v35, %v3149_v34 }
 0xa7d   :  { %2582 = vmatmul.mubr.msk.bf16.vlgmr.msra.gmra.mrb[28].mxu0 %vm122_vm3, %v751_v36 }
 0xa7e   :  { %2629 = vmatprep.mubr.msk.bf16.mxu0 %vm2893_vm1, %v2892_v2 }
 0xb50   :  { %v849_v40 = vpop.f32.mrb[28].mxu0 }
 0xb51   :  { %v2583_v41 = vpop.f32.mrb[29].mxu0  ;;  %v861_v42 = vadd.f32 %v2354_v38, %v849_v40  ;;  %v873_v43 = vadd.f32 %v871_v37, %v849_v40  ;;  %v885_v45 = vadd.f32 %v883_v39, %v849_v40 }
 0xb52   :  { %v852_v44 = vpop.f32.mrb[30].mxu0  ;;  %v2765_v41 = vld [vmem:[%s3463_s1 + $0x98] sm:$0xff]  }
 0xb53   :  { %v862_v46 = vadd.f32 %v2354_v38, %v852_v44  ;;  %v874_v47 = vadd.f32 %v871_v37, %v852_v44  ;;  %v886_v48 = vadd.f32 %v883_v39, %v852_v44  ;;  %v2584_v49 = vpop.f32.mrb[31].mxu0 }
 0xb55   :  { %v863_v50 = vpack.c.bf16 %v862_v46, %v861_v42  ;;  %v875_v51 = vpack.c.bf16 %v874_v47, %v873_v43  ;;  %v3161_v53 = vpack.c.bf16 %v886_v48, %v885_v45  ;;  %v2766_v42 = vld [vmem:[%s3463_s1 + $0xa0] sm:$0xff]  }
 0xb57   :  { %889 = vrot.lane.b32.xlu0 %v875_v51, %s2896_s16 }
 0xbc9   :  { %v890_v55 = vpop.permute.xlu0 %889 }
 0xbca   :  { %v895_v56 = vsel %vm220_vm4, %v890_v55, 0 }
 0xbcb   :  { %2586 = vmatpush3.bf16.xpose.msra.mxu1 %v895_v56  ;;  %v2361_v56 = vld [vmem:[%s3464_s2 + $0xe] ss:$0 sm:$0xff] }
 0xbcc   :  { %2591 = vmatprep.subr.bf16.mxu1 %v2892_v2 }
 0xbd2   :  { %2588 = vmatmul.mubr.msk.bf16.vlgmr.msra.gmra.mrb[8].mxu1 %vm220_vm4, %v863_v50 }
 0xbd3   :  { %2593 = vmatprep.mubr.msk.bf16.mxu1 %vm2893_vm1, %v2892_v2 }
 0xca5   :  { %v931_v57 = vpop.f32.mrb[8].mxu1 }
 0xca6   :  { %v938_v58 = vmul.f32 1.442695, %v931_v57  ;;  %v2589_v59 = vpop.f32.mrb[9].mxu1 }
 0xca7   :  { %v934_v60 = vpop.f32.mrb[10].mxu1 }
 0xca8   :  { %2812 = vpow2.f32 %v938_v58  ;;  %v940_v61 = vmul.f32 1.442695, %v934_v60  ;;  %v2590_v62 = vpop.f32.mrb[11].mxu1 }
 0xcaa   :  { %2814 = vpow2.f32 %v940_v61 }
 0xcb2   :  { %v2813_v63 = vpop.eup %2812 }
 0xcb3   :  { %v942_v24 = vmul.f32 %v2813_v63, %v3010_v52 }
 0xcb4   :  { %v2815_v25 = vpop.eup %2814 }
 0xcb5   :  { %v944_v0 = vsel %vm220_vm4, %v942_v24, 0.0  ;;  %v943_v1 = vmul.f32 %v2815_v25, %v3015_v54 }
 0xcb6   :  { %945 = vadd.xlane.f32.xlu1 %v944_v0 }
 0xcb7   :  { %v947_v3 = vsel %vm220_vm4, %v943_v1, 0.0 }
 0xcb8   :  { %948 = vadd.xlane.f32.xlu0 %v947_v3 }
 0xcc7   :  { %1006 = vrot.lane.b32.xlu1 %v875_v51, %s2897_s21 }
 0xccb   :  { %1004 = vrot.lane.b32.xlu1 %v863_v50, %s2898_s22 }
 0xcce   :  { %956 = vrot.lane.b32.xlu0 %v3161_v53, %s2894_s10 }
 0xd43   :  { %v946_v4 = vpop.xlane.xlu1 %945 }
 0xd44   :  { %2816 = vrcp.f32 %v946_v4 }
 0xd45   :  { %v949_v5 = vpop.xlane.xlu0 %948 }
 0xd46   :  { %2818 = vrcp.f32 %v949_v5 }
 0xd47   :  { %v1007_v11 = vpop.permute.xlu1 %1006 }
 0xd48   :  { %v1012_v13 = vsel %vm220_vm4, %v1007_v11, 0 }
 0xd49   :  { %v957_v6 = vpop.permute.xlu0 %956 }
 0xd4a   :  { %2592 = vmatpush3.bf16.msra.mxu1 %v957_v6 }
 0xd4b   :  { %2597 = vmatprep.subr.bf16.mxu1 %v2892_v2  ;;  %v1005_v14 = vpop.permute.xlu1 %1004 }
 0xd4e   :  { %v2817_v7 = vpop.eup %2816 }
 0xd4f   :  { %v952_v9 = vmul.f32 %v2817_v7, %v942_v24 }
 0xd50   :  { %v2819_v8 = vpop.eup %2818 }
 0xd51   :  { %v953_v10 = vmul.f32 %v2819_v8, %v943_v1 }
 0xd53   :  { %v954_v12 = vpack.c.bf16 %v953_v10, %v952_v9 }
 0xd55   :  { %2594 = vmatmul.mubr.msk.bf16.vlgmr.msra.gmra.mrb[12].mxu1 %vm220_vm4, %v954_v12 }
 0xd56   :  { %2598 = vmatpush3.bf16.xpose.msra.mxu1 %v1012_v13  ;;  %2599 = vmatprep.mubr.msk.bf16.mxu1 %vm2893_vm1, %v2892_v2 }
 0xd57   :  { %2603 = vmatprep.subr.bf16.mxu1 %v2892_v2 }
 0xd5d   :  { %2600 = vmatmul.mubr.msk.bf16.vlgmr.msra.gmra.mrb[16].mxu1 %vm220_vm4, %v1005_v14 }
 0xd5e   :  { %2605 = vmatprep.mubr.msk.bf16.mxu1 %vm2893_vm1, %v2892_v2 }
 0xe28   :  { %v996_v15 = vpop.f32.mrb[12].mxu1 }
 0xe29   :  { %v2595_v16 = vpop.f32.mrb[13].mxu1 }
 0xe2a   :  { %v999_v17 = vpop.f32.mrb[14].mxu1 }
 0xe2b   :  { %v2596_v18 = vpop.f32.mrb[15].mxu1 }
 0xe30   :  { %v1048_v19 = vpop.f32.mrb[16].mxu1 }
 0xe31   :  { %v1055_v20 = vmul.f32 1.442695, %v1048_v19  ;;  %v2601_v21 = vpop.f32.mrb[17].mxu1 }
 0xe32   :  { %v1051_v22 = vpop.f32.mrb[18].mxu1 }
 0xe33   :  { %2820 = vpow2.f32 %v1055_v20  ;;  %v1057_v23 = vmul.f32 1.442695, %v1051_v22  ;;  %v2602_v26 = vpop.f32.mrb[19].mxu1 }
 0xe35   :  { %2822 = vpow2.f32 %v1057_v23  ;;  %v2365_v23 = vld [vmem:[%s3464_s2 + $0x11] ss:$0 sm:$0xff] }
 0xe3d   :  { %v2821_v27 = vpop.eup %2820 }
 0xe3e   :  { %v1059_v28 = vmul.f32 %v2821_v27, %v3010_v52 }
 0xe3f   :  { %v2823_v29 = vpop.eup %2822 }
 0xe40   :  { %v1061_v30 = vsel %vm220_vm4, %v1059_v28, 0.0  ;;  %v1060_v31 = vmul.f32 %v2823_v29, %v3015_v54 }
 0xe41   :  { %1062 = vadd.xlane.f32.xlu0 %v1061_v30  ;;  %v2366_v30 = vld [vmem:[%s3464_s2 + $0x12] ss:$0 sm:$0xff] }
 0xe42   :  { %v1064_v32 = vsel %vm220_vm4, %v1060_v31, 0.0 }
 0xe43   :  { %1065 = vadd.xlane.f32.xlu1 %v1064_v32 }
 0xe57   :  { %1072 = vrot.lane.b32.xlu0 %v3161_v53, %s2899_s23 }
 0xece   :  { %v1063_v33 = vpop.xlane.xlu0 %1062 }
 0xecf   :  { %2824 = vrcp.f32 %v1063_v33 }
 0xed0   :  { %v1066_v36 = vpop.xlane.xlu1 %1065 }
 0xed1   :  { %2826 = vrcp.f32 %v1066_v36 }
 0xed2   :  { %v1073_v37 = vpop.permute.xlu0 %1072 }
 0xed3   :  { %2604 = vmatpush3.bf16.msra.mxu1 %v1073_v37  ;;  %v2769_v37 = vld [vmem:[%s3463_s1 + $0xb8] sm:$0xff]  }
 0xed4   :  { %2609 = vmatprep.subr.bf16.mxu1 %v2892_v2  ;;  %2626 = vmatpush3.bf16.msra.mxu0 %v2769_v37  ;;  %v2376_v37 = vld [vmem:[%s3464_s2 + $0x14] ss:$0 sm:$0xff] }
 0xed5   :  { %2627 = vmatprep.subr.bf16.mxu0 %v2892_v2 }
 0xed9   :  { %v2825_v52 = vpop.eup %2824 }
 0xeda   :  { %v1069_v39 = vmul.f32 %v2825_v52, %v1059_v28  ;;  %v2770_v52 = vld [vmem:[%s3463_s1 + $0xc0] sm:$0xff]  }
 0xedb   :  { %v2827_v38 = vpop.eup %2826  ;;  %2628 = vmatpush3.bf16.msra.mxu0 %v2770_v52 }
 0xedc   :  { %v1070_v40 = vmul.f32 %v2827_v38, %v1060_v31  ;;  %2649 = vmatprep.subr.bf16.mxu0 %v2892_v2  ;;  %v2367_v38 = vld [vmem:[%s3464_s2 + $0xf] ss:$0 sm:$0xff] }
 0xede   :  { %v1071_v54 = vpack.c.bf16 %v1070_v40, %v1069_v39 }
 0xee0   :  { %2606 = vmatmul.mubr.msk.bf16.vlgmr.msra.gmra.mrb[20].mxu1 %vm220_vm4, %v1071_v54 }
 0xee1   :  { %2613 = vmatprep.mubr.msk.bf16.mxu1 %vm2893_vm1, %v2892_v2  ;;  %2610 = vmatpush3.bf16.msra.mxu1 %v2765_v41 }
 0xee2   :  { %2611 = vmatprep.subr.bf16.mxu1 %v2892_v2 }
 0xee5   :  { %2612 = vmatpush3.bf16.msra.mxu1 %v2766_v42 }
 0xee6   :  { %2617 = vmatprep.subr.bf16.mxu1 %v2892_v2 }
 0xfb3   :  { %v1112_v43 = vpop.f32.mrb[20].mxu1 }
 0xfb4   :  { %v2607_v44 = vpop.f32.mrb[21].mxu1 }
 0xfb5   :  { %v1115_v45 = vpop.f32.mrb[22].mxu1 }
 0xfb6   :  { %v2735_v46 = vpack.i.bf16 %v1115_v45, %v1112_v43  ;;  %v2608_v47 = vpop.f32.mrb[23].mxu1 }
 0xfb7   :  { %v2771_v47 = vld [vmem:[%s3463_s1 + $0xc8] sm:$0xff]  }
 0xfb8   :  { %2736 = vrot.lane.b32.xlu1 %v2735_v46, %s2900_s27 }
0x102a   :  { %v2737_v48 = vpop.permute.xlu1 %2736 }
0x102b   :  { %v2739_v49 = vunpack.i.h.bf16 %v2737_v48  ;;  %v2738_v50 = vunpack.i.l.bf16 %v2737_v48  ;;  %v1468_v48 = vsel %vm122_vm3, %v2771_v47, 0 }
0x102d   :  { %v1128_v51 = vsel %vm220_vm4, %v999_v17, %v2739_v49  ;;  %v1127_v53 = vsel %vm220_vm4, %v996_v15, %v2738_v50  ;;  %v2772_v49 = vld [vmem:[%s3463_s1 + $0xd0] sm:$0xff]  }
0x102e   :  { %v1129_v55 = vpack.c.bf16 %v1128_v51, %v1127_v53  ;;  %v1471_v50 = vsel %vm122_vm3, %v2772_v49, 0  ;;  %v2371_v51 = vld [vmem:[%s3464_s2 + $0x10] ss:$0 sm:$0xff] }
0x1030   :  { %2614 = vmatmul.mubr.msk.bf16.vlgmr.msra.gmra.mrb[24].mxu1 %vm122_vm3, %v1129_v55 }
0x1031   :  { %2621 = vmatprep.mubr.msk.bf16.mxu1 %vm2893_vm1, %v2892_v2 }
0x1103   :  { %v1188_v57 = vpop.f32.mrb[24].mxu1 }
0x1104   :  { %v1189_v58 = vadd.f32 %v2361_v56, %v1188_v57  ;;  %v2615_v59 = vpop.f32.mrb[25].mxu1 }
0x1105   :  { %v1191_v60 = vpop.f32.mrb[26].mxu1 }
0x1106   :  { %v1195_v61 = vadd.f32 %v1189_v58, %v3149_v34  ;;  %v1192_v62 = vadd.f32 %v2361_v56, %v1191_v60  ;;  %v2616_v63 = vpop.f32.mrb[27].mxu1  ;;  %v2767_v34 = vld [vmem:[%s3463_s1 + $0xa8] sm:$0xff]  }
0x1107   :  { %2618 = vmatpush3.bf16.msra.mxu1 %v2767_v34 }
0x1108   :  { %v1196_v24 = vadd.f32 %v1192_v62, %v3151_v35  ;;  %v1199_v25 = vsel %vm122_vm3, %v1195_v61, 0.0  ;;  %v1205_v0 = vmul.f32 %v1195_v61, %v1195_v61  ;;  %v2768_v35 = vld [vmem:[%s3463_s1 + $0xb0] sm:$0xff]   ;;  %2619 = vmatprep.subr.bf16.mxu1 %v2892_v2 }
0x1109   :  { %1200 = vadd.xlane.f32.xlu0 %v1199_v25 }
0x110a   :  { %v1202_v1 = vsel %vm122_vm3, %v1196_v24, 0.0  ;;  %v1207_v3 = vsel %vm122_vm3, %v1205_v0, 0.0  ;;  %v1206_v4 = vmul.f32 %v1196_v24, %v1196_v24 }
0x110b   :  { %1203 = vadd.xlane.f32.xlu1 %v1202_v1  ;;  %2620 = vmatpush3.bf16.msra.mxu1 %v2768_v35  ;;  %v2775_v35 = vld [vmem:[%s3463_s1 + $0xe8] sm:$0xff]  }
0x110c   :  { %v1210_v5 = vsel %vm122_vm3, %v1206_v4, 0.0  ;;  %2633 = vmatprep.subr.bf16.mxu1 %v2892_v2 }
0x110d   :  { %1208 = vadd.xlane.f32.xlu0 %v1207_v3  ;;  %v2773_v3 = vld [vmem:[%s3463_s1 + $0xd8] sm:$0xff]  }
0x110e   :  { %v1474_v4 = vsel %vm122_vm3, %v2773_v3, 0 }
0x1111   :  { %1211 = vadd.xlane.f32.xlu0 %v1210_v5  ;;  %v2774_v5 = vld [vmem:[%s3463_s1 + $0xe0] sm:$0xff]  }
0x1112   :  { %v1477_v34 = vsel %vm122_vm3, %v2774_v5, 0 }
0x1196   :  { %v1201_v6 = vpop.xlane.xlu0 %1200 }
0x1197   :  { %v1213_v7 = vmul.f32 0.03125, %v1201_v6  ;;  %v1480_v6 = vsel %vm122_vm3, %v2775_v35, 0 }
0x1198   :  { %v1204_v8 = vpop.xlane.xlu1 %1203 }
0x1199   :  { %v1217_v10 = vmul.f32 %v1213_v7, %v1213_v7  ;;  %v1214_v11 = vmul.f32 0.03125, %v1204_v8  ;;  %v1221_v20 = vsub.f32 %v1195_v61, %v1213_v7  ;;  %v2776_v7 = vld [vmem:[%s3463_s1 + $0xf0] sm:$0xff]  }
0x119a   :  { %v1209_v9 = vpop.xlane.xlu0 %1208  ;;  %v1483_v8 = vsel %vm122_vm3, %v2776_v7, 0 }
0x119b   :  { %v1215_v12 = vmul.f32 0.03125, %v1209_v9  ;;  %v1218_v15 = vmul.f32 %v1214_v11, %v1214_v11  ;;  %v1222_v26 = vsub.f32 %v1196_v24, %v1214_v11  ;;  %v2385_v9 = vld [vmem:[%s3464_s2 + $0x16] ss:$0 sm:$0xff] }
0x119d   :  { %v1219_v13 = vsub.f32 %v1215_v12, %v1217_v10  ;;  %v2386_v10 = vld [vmem:[%s3464_s2 + $0x17] ss:$0 sm:$0xff] }
0x119e   :  { %v1212_v14 = vpop.xlane.xlu0 %1211 }
0x119f   :  { %v1223_v16 = vadd.f32 1e-05, %v1219_v13  ;;  %v1216_v17 = vmul.f32 0.03125, %v1212_v14 }
0x11a1   :  { %2828 = vrsqrt.f32 %v1223_v16  ;;  %v1220_v18 = vsub.f32 %v1216_v17, %v1218_v15 }
0x11a3   :  { %v1224_v19 = vadd.f32 1e-05, %v1220_v18 }
0x11a5   :  { %2830 = vrsqrt.f32 %v1224_v19 }
0x11ab   :  { %v2829_v21 = vpop.eup %2828 }
0x11ac   :  { %v1227_v22 = vmul.f32 %v2829_v21, %v1221_v20 }
0x11ae   :  { %v1233_v29 = vmul.f32 %v2365_v23, %v1227_v22 }
0x11af   :  { %v2831_v27 = vpop.eup %2830 }
0x11b0   :  { %v1228_v28 = vmul.f32 %v2831_v27, %v1222_v26  ;;  %v1239_v32 = vadd.f32 %v2366_v30, %v1233_v29  ;;  %v2375_v29 = vld [vmem:[%s3464_s2 + $0x13] ss:$0 sm:$0xff] }
0x11b2   :  { %v1234_v31 = vmul.f32 %v2365_v23, %v1228_v28 }
0x11b4   :  { %v1240_v33 = vadd.f32 %v2366_v30, %v1234_v31 }
0x11b6   :  { %v1241_v36 = vpack.c.bf16 %v1240_v33, %v1239_v32 }
0x11b8   :  { %2622 = vmatmul.mubr.msk.bf16.vlgmr.msra.gmra.mrb[28].mxu1 %vm122_vm3, %v1241_v36 }
0x11b9   :  { %2645 = vmatprep.mubr.msk.bf16.mxu1 %vm2893_vm1, %v2892_v2  ;;  %2634 = vmatpush3.bf16.xpose.msra.mxu1 %v1468_v48 }
0x11ba   :  { %2635 = vmatprep.subr.bf16.mxu1 %v2892_v2 }
0x11c1   :  { %2636 = vmatpush3.bf16.xpose.msra.mxu1 %v1471_v50 }
0x11c2   :  { %2637 = vmatprep.subr.bf16.mxu1 %v2892_v2 }
0x11c9   :  { %2638 = vmatpush3.bf16.xpose.msra.mxu1 %v1474_v4 }
0x11ca   :  { %2639 = vmatprep.subr.bf16.mxu1 %v2892_v2 }
0x11d1   :  { %2640 = vmatpush3.bf16.xpose.msra.mxu1 %v1477_v34  ;;  %v2867_v34 = vld [vmem:[%s3465_s3 + $0x8] sm:$0xff] }
0x11d2   :  { %2641 = vmatprep.subr.bf16.mxu1 %v2892_v2 }
0x11d9   :  { %2642 = vmatpush3.bf16.xpose.msra.mxu1 %v1480_v6 }
0x11da   :  { %2643 = vmatprep.subr.bf16.mxu1 %v2892_v2 }
0x11e1   :  { %2644 = vmatpush3.bf16.xpose.msra.mxu1 %v1483_v8 }
0x11e2   :  { %2689 = vmatprep.subr.bf16.mxu1 %v2892_v2 }
0x128b   :  { %v1300_v39 = vpop.f32.mrb[28].mxu1 }
0x128c   :  { %v1301_v40 = vadd.f32 %v2367_v38, %v1300_v39  ;;  %v2623_v54 = vpop.f32.mrb[29].mxu1 }
0x128d   :  { %v1303_v41 = vpop.f32.mrb[30].mxu1 }
0x128e   :  { %v1304_v42 = vadd.f32 %v2367_v38, %v1303_v41  ;;  %v2624_v43 = vpop.f32.mrb[31].mxu1  ;;  %v1307_v44 = vmax.f32 %v1301_v40, 0.0  ;;  %v2384_v41 = vld [vmem:[%s3464_s2 + $0x15] ss:$0 sm:$0xff] }
0x1290   :  { %v1308_v45 = vmax.f32 %v1304_v42, 0.0 }
0x1292   :  { %v1309_v46 = vpack.c.bf16 %v1308_v45, %v1307_v44 }
0x1294   :  { %2630 = vmatmul.mubr.msk.bf16.vlgmr.msra.gmra.mrb[32].mxu0 %vm122_vm3, %v1309_v46 }
0x1295   :  { %2651 = vmatprep.mubr.msk.bf16.mxu0 %vm2893_vm1, %v2892_v2 }
0x1367   :  { %v1368_v53 = vpop.f32.mrb[32].mxu0 }
0x1368   :  { %v1369_v55 = vadd.f32 %v2371_v51, %v1368_v53  ;;  %v2631_v56 = vpop.f32.mrb[33].mxu0 }
0x1369   :  { %v1371_v57 = vpop.f32.mrb[34].mxu0 }
0x136a   :  { %v1375_v58 = vadd.f32 %v1369_v55, %v1239_v32  ;;  %v1372_v59 = vadd.f32 %v2371_v51, %v1371_v57  ;;  %v2632_v60 = vpop.f32.mrb[35].mxu0 }
0x136c   :  { %v1376_v61 = vadd.f32 %v1372_v59, %v1240_v33  ;;  %v1379_v62 = vsel %vm122_vm3, %v1375_v58, 0.0  ;;  %v1385_v63 = vmul.f32 %v1375_v58, %v1375_v58 }
0x136d   :  { %1380 = vadd.xlane.f32.xlu1 %v1379_v62 }
0x136e   :  { %v1382_v24 = vsel %vm122_vm3, %v1376_v61, 0.0  ;;  %v1386_v25 = vmul.f32 %v1376_v61, %v1376_v61  ;;  %v1387_v0 = vsel %vm122_vm3, %v1385_v63, 0.0 }
0x136f   :  { %1383 = vadd.xlane.f32.xlu0 %v1382_v24 }
0x1370   :  { %v1390_v1 = vsel %vm122_vm3, %v1386_v25, 0.0 }
0x1371   :  { %1388 = vadd.xlane.f32.xlu1 %v1387_v0 }
0x1373   :  { %1391 = vadd.xlane.f32.xlu0 %v1390_v1  ;;  %v2866_v1 = vld [vmem:[%s3465_s3] sm:$0xff] }
0x1382   :  { %1540 = vrot.lane.b32.xlu1 %v2385_v9, %s2895_s11 }
0x1386   :  { %1552 = vrot.lane.b32.xlu1 %v2386_v10, %s2894_s10 }
0x13fa   :  { %v1381_v11 = vpop.xlane.xlu1 %1380 }
0x13fb   :  { %v1393_v12 = vmul.f32 0.03125, %v1381_v11 }
0x13fc   :  { %v1384_v13 = vpop.xlane.xlu0 %1383 }
0x13fd   :  { %v1394_v14 = vmul.f32 0.03125, %v1384_v13  ;;  %v1397_v16 = vmul.f32 %v1393_v12, %v1393_v12  ;;  %v1401_v27 = vsub.f32 %v1375_v58, %v1393_v12 }
0x13fe   :  { %v1389_v15 = vpop.xlane.xlu1 %1388 }
0x13ff   :  { %v1395_v17 = vmul.f32 0.03125, %v1389_v15  ;;  %v1398_v19 = vmul.f32 %v1394_v14, %v1394_v14  ;;  %v1402_v30 = vsub.f32 %v1376_v61, %v1394_v14 }
0x1400   :  { %v1392_v18 = vpop.xlane.xlu0 %1391 }
0x1401   :  { %v1399_v20 = vsub.f32 %v1395_v17, %v1397_v16  ;;  %v1396_v21 = vmul.f32 0.03125, %v1392_v18 }
0x1402   :  { %v1541_v54 = vpop.permute.xlu1 %1540 }
0x1403   :  { %v1403_v22 = vadd.f32 1e-05, %v1399_v20  ;;  %v1400_v23 = vsub.f32 %v1396_v21, %v1398_v19 }
0x1405   :  { %2832 = vrsqrt.f32 %v1403_v22  ;;  %v1404_v26 = vadd.f32 1e-05, %v1400_v23 }
0x1406   :  { %v1553_v42 = vpop.permute.xlu1 %1552 }
0x1407   :  { %2834 = vrsqrt.f32 %v1404_v26 }
0x140f   :  { %v2833_v28 = vpop.eup %2832 }
0x1410   :  { %v1407_v31 = vmul.f32 %v2833_v28, %v1401_v27 }
0x1411   :  { %v2835_v32 = vpop.eup %2834 }
0x1412   :  { %v1408_v33 = vmul.f32 %v2835_v32, %v1402_v30  ;;  %v1413_v36 = vmul.f32 %v2375_v29, %v1407_v31 }
0x1414   :  { %v1414_v52 = vmul.f32 %v2375_v29, %v1408_v33  ;;  %v3301_v38 = vadd.f32 %v2376_v37, %v1413_v36 }
0x1416   :  { %v3303_v39 = vadd.f32 %v2376_v37, %v1414_v52 }
0x1418   :  { %v1421_v40 = vpack.c.bf16 %v3303_v39, %v3301_v38 }
0x141a   :  { %2646 = vmatmul.mubr.msk.bf16.vlgmr.msra.gmra.mrb[32].mxu1 %vm122_vm3, %v1421_v40 }
0x141b   :  { %2693 = vmatprep.mubr.msk.bf16.mxu1 %vm2893_vm1, %v2892_v2 }
0x14ed   :  { %v1519_v43 = vpop.f32.mrb[32].mxu1 }
0x14ee   :  { %v2647_v44 = vpop.f32.mrb[33].mxu1  ;;  %v1531_v45 = vadd.f32 %v2384_v41, %v1519_v43  ;;  %v1543_v46 = vadd.f32 %v1541_v54, %v1519_v43  ;;  %v1555_v48 = vadd.f32 %v1553_v42, %v1519_v43 }
0x14ef   :  { %v1522_v47 = vpop.f32.mrb[34].mxu1 }
0x14f0   :  { %v1532_v49 = vadd.f32 %v2384_v41, %v1522_v47  ;;  %v1544_v50 = vadd.f32 %v1541_v54, %v1522_v47  ;;  %v1556_v51 = vadd.f32 %v1553_v42, %v1522_v47  ;;  %v2648_v53 = vpop.f32.mrb[35].mxu1  ;;  %v2778_v47 = vld [vmem:[%s3463_s1 + $0x100] sm:$0xff]  }
0x14f2   :  { %v1533_v55 = vpack.c.bf16 %v1532_v49, %v1531_v45  ;;  %v1545_v56 = vpack.c.bf16 %v1544_v50, %v1543_v46  ;;  %v3313_v57 = vpack.c.bf16 %v1556_v51, %v1555_v48  ;;  %v2777_v46 = vld [vmem:[%s3463_s1 + $0xf8] sm:$0xff]  }
0x14f4   :  { %1559 = vrot.lane.b32.xlu0 %v1545_v56, %s2896_s16 }
0x1566   :  { %v1560_v58 = vpop.permute.xlu0 %1559 }
0x1567   :  { %v1565_v59 = vsel %vm220_vm4, %v1560_v58, 0 }
0x1568   :  { %2650 = vmatpush3.bf16.xpose.msra.mxu0 %v1565_v59 }
0x1569   :  { %2655 = vmatprep.subr.bf16.mxu0 %v2892_v2 }
0x156f   :  { %2652 = vmatmul.mubr.msk.bf16.vlgmr.msra.gmra.mrb[36].mxu0 %vm220_vm4, %v1533_v55 }
0x1570   :  { %2657 = vmatprep.mubr.msk.bf16.mxu0 %vm2893_vm1, %v2892_v2 }
0x1642   :  { %v1601_v60 = vpop.f32.mrb[36].mxu0 }
0x1643   :  { %v1608_v61 = vmul.f32 1.442695, %v1601_v60  ;;  %v2653_v62 = vpop.f32.mrb[37].mxu0 }
0x1644   :  { %v1604_v63 = vpop.f32.mrb[38].mxu0 }
0x1645   :  { %2836 = vpow2.f32 %v1608_v61  ;;  %v1610_v24 = vmul.f32 1.442695, %v1604_v63  ;;  %v2654_v25 = vpop.f32.mrb[39].mxu0  ;;  %v2391_v61 = vld [vmem:[%s3464_s2 + $0x18] ss:$0 sm:$0xff] }
0x1647   :  { %2838 = vpow2.f32 %v1610_v24 }
0x164f   :  { %v2837_v0 = vpop.eup %2836 }
0x1650   :  { %v1612_v3 = vmul.f32 %v2866_v1, %v2837_v0 }
0x1651   :  { %v2839_v4 = vpop.eup %2838 }
0x1652   :  { %v1614_v5 = vsel %vm220_vm4, %v1612_v3, 0.0  ;;  %v1613_v35 = vmul.f32 %v2867_v34, %v2839_v4 }
0x1653   :  { %1615 = vadd.xlane.f32.xlu1 %v1614_v5 }
0x1654   :  { %v1617_v6 = vsel %vm220_vm4, %v1613_v35, 0.0 }
0x1655   :  { %1618 = vadd.xlane.f32.xlu0 %v1617_v6 }
0x1664   :  { %1676 = vrot.lane.b32.xlu1 %v1545_v56, %s2897_s21 }
0x1668   :  { %1674 = vrot.lane.b32.xlu1 %v1533_v55, %s2898_s22 }
0x166b   :  { %1626 = vrot.lane.b32.xlu0 %v3313_v57, %s2894_s10 }
0x16e0   :  { %v1616_v7 = vpop.xlane.xlu1 %1615 }
0x16e1   :  { %2840 = vrcp.f32 %v1616_v7 }
0x16e2   :  { %v1619_v8 = vpop.xlane.xlu0 %1618 }
0x16e3   :  { %2842 = vrcp.f32 %v1619_v8 }
0x16e4   :  { %v1677_v14 = vpop.permute.xlu1 %1676 }
0x16e5   :  { %v1682_v16 = vsel %vm220_vm4, %v1677_v14, 0 }
0x16e6   :  { %v1627_v9 = vpop.permute.xlu0 %1626 }
0x16e7   :  { %2656 = vmatpush3.bf16.msra.mxu0 %v1627_v9 }
0x16e8   :  { %2661 = vmatprep.subr.bf16.mxu0 %v2892_v2  ;;  %v1675_v17 = vpop.permute.xlu1 %1674 }
0x16eb   :  { %v2841_v10 = vpop.eup %2840 }
0x16ec   :  { %v1622_v12 = vmul.f32 %v2841_v10, %v1612_v3 }
0x16ed   :  { %v2843_v11 = vpop.eup %2842 }
0x16ee   :  { %v1623_v13 = vmul.f32 %v2843_v11, %v1613_v35 }
0x16f0   :  { %v1624_v15 = vpack.c.bf16 %v1623_v13, %v1622_v12 }
0x16f2   :  { %2658 = vmatmul.mubr.msk.bf16.vlgmr.msra.gmra.mrb[40].mxu0 %vm220_vm4, %v1624_v15 }
0x16f3   :  { %2662 = vmatpush3.bf16.xpose.msra.mxu0 %v1682_v16  ;;  %2663 = vmatprep.mubr.msk.bf16.mxu0 %vm2893_vm1, %v2892_v2 }
0x16f4   :  { %2667 = vmatprep.subr.bf16.mxu0 %v2892_v2 }
0x16fa   :  { %2664 = vmatmul.mubr.msk.bf16.vlgmr.msra.gmra.mrb[44].mxu0 %vm220_vm4, %v1675_v17 }
0x16fb   :  { %2669 = vmatprep.mubr.msk.bf16.mxu0 %vm2893_vm1, %v2892_v2 }
0x17c5   :  { %v1666_v18 = vpop.f32.mrb[40].mxu0 }
0x17c6   :  { %v2659_v19 = vpop.f32.mrb[41].mxu0 }
0x17c7   :  { %v1669_v20 = vpop.f32.mrb[42].mxu0 }
0x17c8   :  { %v2660_v21 = vpop.f32.mrb[43].mxu0 }
0x17cd   :  { %v1718_v22 = vpop.f32.mrb[44].mxu0 }
0x17ce   :  { %v1725_v23 = vmul.f32 1.442695, %v1718_v22  ;;  %v2665_v26 = vpop.f32.mrb[45].mxu0 }
0x17cf   :  { %v1721_v27 = vpop.f32.mrb[46].mxu0 }
0x17d0   :  { %2844 = vpow2.f32 %v1725_v23  ;;  %v1727_v28 = vmul.f32 1.442695, %v1721_v27  ;;  %v2666_v29 = vpop.f32.mrb[47].mxu0 }
0x17d2   :  { %2846 = vpow2.f32 %v1727_v28  ;;  %v2395_v28 = vld [vmem:[%s3464_s2 + $0x1b] ss:$0 sm:$0xff] }
0x17da   :  { %v2845_v30 = vpop.eup %2844 }
0x17db   :  { %v1729_v31 = vmul.f32 %v2866_v1, %v2845_v30 }
0x17dc   :  { %v2847_v32 = vpop.eup %2846 }
0x17dd   :  { %v1731_v33 = vsel %vm220_vm4, %v1729_v31, 0.0  ;;  %v1730_v36 = vmul.f32 %v2867_v34, %v2847_v32 }
0x17de   :  { %1732 = vadd.xlane.f32.xlu0 %v1731_v33  ;;  %v2396_v33 = vld [vmem:[%s3464_s2 + $0x1c] ss:$0 sm:$0xff] }
0x17df   :  { %v1734_v37 = vsel %vm220_vm4, %v1730_v36, 0.0 }
0x17e0   :  { %1735 = vadd.xlane.f32.xlu1 %v1734_v37 }
0x17f4   :  { %1742 = vrot.lane.b32.xlu0 %v3313_v57, %s2899_s23 }
0x186b   :  { %v1733_v52 = vpop.xlane.xlu0 %1732 }
0x186c   :  { %2848 = vrcp.f32 %v1733_v52 }
0x186d   :  { %v1736_v40 = vpop.xlane.xlu1 %1735 }
0x186e   :  { %2850 = vrcp.f32 %v1736_v40 }
0x186f   :  { %v1743_v54 = vpop.permute.xlu0 %1742 }
0x1870   :  { %2668 = vmatpush3.bf16.msra.mxu0 %v1743_v54  ;;  %v2781_v54 = vld [vmem:[%s3463_s1 + $0x118] sm:$0xff]  }
0x1871   :  { %2673 = vmatprep.subr.bf16.mxu0 %v2892_v2  ;;  %2690 = vmatpush3.bf16.msra.mxu1 %v2781_v54 }
0x1872   :  { %2691 = vmatprep.subr.bf16.mxu1 %v2892_v2 }
0x1876   :  { %v2849_v41 = vpop.eup %2848 }
0x1877   :  { %v1739_v43 = vmul.f32 %v2849_v41, %v1729_v31  ;;  %v2782_v41 = vld [vmem:[%s3463_s1 + $0x120] sm:$0xff]  }
0x1878   :  { %v2851_v42 = vpop.eup %2850  ;;  %2692 = vmatpush3.bf16.msra.mxu1 %v2782_v41 }
0x1879   :  { %v1740_v44 = vmul.f32 %v2851_v42, %v1730_v36  ;;  %2705 = vmatprep.subr.bf16.mxu1 %v2892_v2  ;;  %v2397_v42 = vld [vmem:[%s3464_s2 + $0x19] ss:$0 sm:$0xff] }
0x187b   :  { %v1741_v45 = vpack.c.bf16 %v1740_v44, %v1739_v43 }
0x187d   :  { %2670 = vmatmul.mubr.msk.bf16.vlgmr.msra.gmra.mrb[48].mxu0 %vm220_vm4, %v1741_v45 }
0x187e   :  { %2677 = vmatprep.mubr.msk.bf16.mxu0 %vm2893_vm1, %v2892_v2  ;;  %2674 = vmatpush3.bf16.msra.mxu0 %v2777_v46 }
0x187f   :  { %2675 = vmatprep.subr.bf16.mxu0 %v2892_v2 }
0x1882   :  { %2676 = vmatpush3.bf16.msra.mxu0 %v2778_v47 }
0x1883   :  { %2681 = vmatprep.subr.bf16.mxu0 %v2892_v2 }
0x1950   :  { %v1782_v48 = vpop.f32.mrb[48].mxu0 }
0x1951   :  { %v2671_v49 = vpop.f32.mrb[49].mxu0 }
0x1952   :  { %v1785_v50 = vpop.f32.mrb[50].mxu0 }
0x1953   :  { %v2740_v51 = vpack.i.bf16 %v1785_v50, %v1782_v48  ;;  %v2672_v53 = vpop.f32.mrb[51].mxu0 }
0x1954   :  { %v2401_v53 = vld [vmem:[%s3464_s2 + $0x1a] ss:$0 sm:$0xff] }
0x1955   :  { %2741 = vrot.lane.b32.xlu1 %v2740_v51, %s2900_s27 }
0x19c7   :  { %v2742_v55 = vpop.permute.xlu1 %2741 }
0x19c8   :  { %v2744_v56 = vunpack.i.h.bf16 %v2742_v55  ;;  %v2743_v57 = vunpack.i.l.bf16 %v2742_v55 }
0x19ca   :  { %v1798_v58 = vsel %vm220_vm4, %v1669_v20, %v2744_v56  ;;  %v1797_v59 = vsel %vm220_vm4, %v1666_v18, %v2743_v57 }
0x19cb   :  { %v1799_v60 = vpack.c.bf16 %v1798_v58, %v1797_v59 }
0x19cd   :  { %2678 = vmatmul.mubr.msk.bf16.vlgmr.msra.gmra.mrb[52].mxu0 %vm122_vm3, %v1799_v60 }
0x19ce   :  { %2685 = vmatprep.mubr.msk.bf16.mxu0 %vm2893_vm1, %v2892_v2 }
0x1aa0   :  { %v1858_v62 = vpop.f32.mrb[52].mxu0 }
0x1aa1   :  { %v1859_v63 = vadd.f32 %v2391_v61, %v1858_v62  ;;  %v2679_v24 = vpop.f32.mrb[53].mxu0 }
0x1aa2   :  { %v1861_v25 = vpop.f32.mrb[54].mxu0 }
0x1aa3   :  { %v1865_v0 = vadd.f32 %v1859_v63, %v3301_v38  ;;  %v1862_v1 = vadd.f32 %v2391_v61, %v1861_v25  ;;  %v2680_v3 = vpop.f32.mrb[55].mxu0  ;;  %v2779_v38 = vld [vmem:[%s3463_s1 + $0x108] sm:$0xff]  }
0x1aa4   :  { %2682 = vmatpush3.bf16.msra.mxu0 %v2779_v38 }
0x1aa5   :  { %v1866_v4 = vadd.f32 %v1862_v1, %v3303_v39  ;;  %v1869_v5 = vsel %vm122_vm3, %v1865_v0, 0.0  ;;  %v1875_v34 = vmul.f32 %v1865_v0, %v1865_v0  ;;  %v2780_v39 = vld [vmem:[%s3463_s1 + $0x110] sm:$0xff]   ;;  %2683 = vmatprep.subr.bf16.mxu0 %v2892_v2 }
0x1aa6   :  { %1870 = vadd.xlane.f32.xlu0 %v1869_v5  ;;  %v2784_v5 = vld [vmem:[%s3463_s1 + $0x130] sm:$0xff]  }
0x1aa7   :  { %v1872_v35 = vsel %vm122_vm3, %v1866_v4, 0.0  ;;  %v1877_v6 = vsel %vm122_vm3, %v1875_v34, 0.0  ;;  %v1876_v7 = vmul.f32 %v1866_v4, %v1866_v4 }
0x1aa8   :  { %1873 = vadd.xlane.f32.xlu1 %v1872_v35  ;;  %2684 = vmatpush3.bf16.msra.mxu0 %v2780_v39 }
0x1aa9   :  { %v1880_v8 = vsel %vm122_vm3, %v1876_v7, 0.0  ;;  %2697 = vmatprep.subr.bf16.mxu0 %v2892_v2 }
0x1aaa   :  { %1878 = vadd.xlane.f32.xlu0 %v1877_v6 }
0x1aae   :  { %1881 = vadd.xlane.f32.xlu0 %v1880_v8 }
0x1b33   :  { %v1871_v9 = vpop.xlane.xlu0 %1870 }
0x1b34   :  { %v1883_v10 = vmul.f32 0.03125, %v1871_v9 }
0x1b35   :  { %v1874_v11 = vpop.xlane.xlu1 %1873 }
0x1b36   :  { %v1887_v13 = vmul.f32 %v1883_v10, %v1883_v10  ;;  %v1884_v14 = vmul.f32 0.03125, %v1874_v11  ;;  %v1891_v23 = vsub.f32 %v1865_v0, %v1883_v10 }
0x1b37   :  { %v1879_v12 = vpop.xlane.xlu0 %1878 }
0x1b38   :  { %v1885_v15 = vmul.f32 0.03125, %v1879_v12  ;;  %v1888_v18 = vmul.f32 %v1884_v14, %v1884_v14  ;;  %v1892_v29 = vsub.f32 %v1866_v4, %v1884_v14  ;;  %v2783_v4 = vld [vmem:[%s3463_s1 + $0x128] sm:$0xff]  }
0x1b3a   :  { %v1889_v16 = vsub.f32 %v1885_v15, %v1887_v13 }
0x1b3b   :  { %v1882_v17 = vpop.xlane.xlu0 %1881 }
0x1b3c   :  { %v1893_v19 = vadd.f32 1e-05, %v1889_v16  ;;  %v1886_v20 = vmul.f32 0.03125, %v1882_v17 }
0x1b3e   :  { %2852 = vrsqrt.f32 %v1893_v19  ;;  %v1890_v21 = vsub.f32 %v1886_v20, %v1888_v18  ;;  %v2405_v18 = vld [vmem:[%s3464_s2 + $0x1d] ss:$0 sm:$0xff] }
0x1b40   :  { %v1894_v22 = vadd.f32 1e-05, %v1890_v21 }
0x1b42   :  { %2854 = vrsqrt.f32 %v1894_v22 }
0x1b48   :  { %v2853_v26 = vpop.eup %2852 }
0x1b49   :  { %v1897_v27 = vmul.f32 %v2853_v26, %v1891_v23  ;;  %v2406_v26 = vld [vmem:[%s3464_s2 + $0x1e] ss:$0 sm:$0xff] }
0x1b4b   :  { %v1903_v32 = vmul.f32 %v2395_v28, %v1897_v27 }
0x1b4c   :  { %v2855_v30 = vpop.eup %2854 }
0x1b4d   :  { %v1898_v31 = vmul.f32 %v2855_v30, %v1892_v29  ;;  %v1909_v37 = vadd.f32 %v2396_v33, %v1903_v32  ;;  %v2786_v32 = vld [vmem:[%s3463_s1 + $0x140] sm:$0xff]  }
0x1b4f   :  { %v1904_v36 = vmul.f32 %v2395_v28, %v1898_v31  ;;  %v2785_v31 = vld [vmem:[%s3463_s1 + $0x138] sm:$0xff]  }
0x1b51   :  { %v1910_v52 = vadd.f32 %v2396_v33, %v1904_v36  ;;  %v2407_v33 = vld [vmem:[%s3464_s2 + $0x1f] ss:$0 sm:$0xff] }
0x1b53   :  { %v1911_v40 = vpack.c.bf16 %v1910_v52, %v1909_v37 }
0x1b55   :  { %2686 = vmatmul.mubr.msk.bf16.vlgmr.msra.gmra.mrb[56].mxu0 %vm122_vm3, %v1911_v40 }
0x1b56   :  { %2701 = vmatprep.mubr.msk.bf16.mxu0 %vm2893_vm1, %v2892_v2  ;;  %2698 = vmatpush3.bf16.msra.mxu0 %v2783_v4 }
0x1b57   :  { %2699 = vmatprep.subr.bf16.mxu0 %v2892_v2 }
0x1b5a   :  { %2700 = vmatpush3.bf16.msra.mxu0 %v2784_v5 }
0x1b5b   :  { %2713 = vmatprep.subr.bf16.mxu0 %v2892_v2 }
0x1c28   :  { %v1970_v43 = vpop.f32.mrb[56].mxu0 }
0x1c29   :  { %v1971_v44 = vadd.f32 %v2397_v42, %v1970_v43  ;;  %v2687_v45 = vpop.f32.mrb[57].mxu0 }
0x1c2a   :  { %v1973_v46 = vpop.f32.mrb[58].mxu0  ;;  %v2901_v45 = vmov 0  }
0x1c2b   :  { %v1974_v47 = vadd.f32 %v2397_v42, %v1973_v46  ;;  %v2688_v48 = vpop.f32.mrb[59].mxu0  ;;  %v1977_v49 = vmax.f32 %v1971_v44, 0.0  ;;  %2745 = vset.pattern.permute.xlu1 %v2901_v45  ;;  %2746 = vset.pattern.permute.xlu0 %v2901_v45  ;;  %v2411_v46 = vld [vmem:[%s3464_s2 + $0x20] ss:$0 sm:$0xff] }
0x1c2d   :  { %v1978_v50 = vmax.f32 %v1974_v47, 0.0 }
0x1c2f   :  { %v1979_v51 = vpack.c.bf16 %v1978_v50, %v1977_v49 }
0x1c31   :  { %2694 = vmatmul.mubr.msk.bf16.vlgmr.msra.gmra.mrb[36].mxu1 %vm122_vm3, %v1979_v51 }
0x1c32   :  { %2709 = vmatprep.mubr.msk.bf16.mxu1 %vm2893_vm1, %v2892_v2  ;;  %2706 = vmatpush3.bf16.msra.mxu1 %v2785_v31 }
0x1c33   :  { %2707 = vmatprep.subr.bf16.mxu1 %v2892_v2 }
0x1c36   :  { %2708 = vmatpush3.bf16.msra.mxu1 %v2786_v32 }
0x1d04   :  { %v2038_v55 = vpop.f32.mrb[36].mxu1 }
0x1d05   :  { %v2039_v56 = vadd.f32 %v2401_v53, %v2038_v55  ;;  %v2695_v57 = vpop.f32.mrb[37].mxu1 }
0x1d06   :  { %v2041_v58 = vpop.f32.mrb[38].mxu1 }
0x1d07   :  { %v2045_v59 = vadd.f32 %v2039_v56, %v1909_v37  ;;  %v2042_v60 = vadd.f32 %v2401_v53, %v2041_v58  ;;  %v2696_v61 = vpop.f32.mrb[39].mxu1 }
0x1d09   :  { %v2046_v62 = vadd.f32 %v2042_v60, %v1910_v52  ;;  %v2049_v63 = vsel %vm122_vm3, %v2045_v59, 0.0  ;;  %v2055_v24 = vmul.f32 %v2045_v59, %v2045_v59 }
0x1d0a   :  { %2050 = vadd.xlane.f32.xlu1 %v2049_v63 }
0x1d0b   :  { %v2052_v25 = vsel %vm122_vm3, %v2046_v62, 0.0  ;;  %v2056_v0 = vmul.f32 %v2046_v62, %v2046_v62  ;;  %v2057_v1 = vsel %vm122_vm3, %v2055_v24, 0.0 }
0x1d0c   :  { %2053 = vadd.xlane.f32.xlu0 %v2052_v25 }
0x1d0d   :  { %v2060_v3 = vsel %vm122_vm3, %v2056_v0, 0.0 }
0x1d0e   :  { %2058 = vadd.xlane.f32.xlu1 %v2057_v1 }
0x1d10   :  { %2061 = vadd.xlane.f32.xlu0 %v2060_v3 }
0x1d97   :  { %v2051_v34 = vpop.xlane.xlu1 %2050 }
0x1d98   :  { %v2063_v35 = vmul.f32 0.03125, %v2051_v34 }
0x1d99   :  { %v2054_v6 = vpop.xlane.xlu0 %2053 }
0x1d9a   :  { %v2064_v7 = vmul.f32 0.03125, %v2054_v6  ;;  %v2067_v38 = vmul.f32 %v2063_v35, %v2063_v35  ;;  %v2071_v16 = vsub.f32 %v2045_v59, %v2063_v35  ;;  %v2787_v59 = vld [vmem:[%s3463_s1 + $0x148] sm:$0xff]   ;;  %s2902_s1 = smov [#allocation2]  }
0x1d9b   :  { %v2059_v8 = vpop.xlane.xlu1 %2058 }
0x1d9c   :  { %v2065_v39 = vmul.f32 0.03125, %v2059_v8  ;;  %v2068_v10 = vmul.f32 %v2064_v7, %v2064_v7  ;;  %v2072_v19 = vsub.f32 %v2046_v62, %v2064_v7 }
0x1d9d   :  { %v2062_v9 = vpop.xlane.xlu0 %2061 }
0x1d9e   :  { %v2069_v11 = vsub.f32 %v2065_v39, %v2067_v38  ;;  %v2066_v12 = vmul.f32 0.03125, %v2062_v9 }
0x1da0   :  { %v2073_v13 = vadd.f32 1e-05, %v2069_v11  ;;  %v2070_v14 = vsub.f32 %v2066_v12, %v2068_v10 }
0x1da2   :  { %2856 = vrsqrt.f32 %v2073_v13  ;;  %v2074_v15 = vadd.f32 1e-05, %v2070_v14 }
0x1da4   :  { %2858 = vrsqrt.f32 %v2074_v15 }
0x1dac   :  { %v2857_v17 = vpop.eup %2856 }
0x1dad   :  { %v2077_v20 = vmul.f32 %v2857_v17, %v2071_v16 }
0x1dae   :  { %v2859_v21 = vpop.eup %2858 }
0x1daf   :  { %v2078_v22 = vmul.f32 %v2859_v21, %v2072_v19  ;;  %v2083_v23 = vmul.f32 %v2405_v18, %v2077_v20 }
0x1db1   :  { %v2084_v27 = vmul.f32 %v2405_v18, %v2078_v22  ;;  %v2089_v28 = vadd.f32 %v2406_v26, %v2083_v23 }
0x1db3   :  { %v2090_v29 = vadd.f32 %v2406_v26, %v2084_v27 }
0x1db5   :  { %v2091_v30 = vpack.c.bf16 %v2090_v29, %v2089_v28 }
0x1db7   :  { %2702 = vmatmul.mubr.msk.bf16.vlgmr.msra.gmra.mrb[60].mxu0 %vm122_vm3, %v2091_v30 }
0x1db8   :  { %2715 = vmatprep.mubr.msk.bf16.mxu0 %vm2893_vm1, %v2892_v2  ;;  %v2281_v2 = vld [vmem:[%s3464_s2 + $0x21] sm:$0x1]  ;;  %s2307_s2 = sshll.u32 %s2902_s1, 4  ;;  %s2308_s2 = int_to_ptr.vmem [resolvable:$true] %s2307_s2 }
0x1db9   :  { %2284 = vperm.xlu1 %2745, %v2281_v2   ;;  %s2868_s19 = scalar_lea.vmem %s2308_s2, 16  ;;  %s2872_s20 = scalar_lea.vmem %s2308_s2, 32 }
0x1dba   :  { %p2869_p0 = scmp.ne.s32.totalorder %s2308_s2, %s2868_s19  ;;  %p2873_p1 = scmp.lt.s32.totalorder %s2308_s2, %s2308_s2 }
0x1dbb   :  { %p2874_p2 = scmp.lt.s32.totalorder %s2872_s20, %s2868_s19 }
0x1dbd   :  { %p2875_p3 = por %p2874_p2, %p2873_p1 }
0x1dbf   :  { %p2876_p4 = pnand %p2875_p3, %p2869_p0 }
0x1e38   :  { %v2285_v60 = vpop.permute.xlu1 %2284 }
0x1e8a   :  { %v2150_v36 = vpop.f32.mrb[60].mxu0 }
0x1e8b   :  { %v2151_v37 = vadd.f32 %v2407_v33, %v2150_v36  ;;  %v2703_v52 = vpop.f32.mrb[61].mxu0 }
0x1e8c   :  { %v2153_v40 = vpop.f32.mrb[62].mxu0 }
0x1e8d   :  { %v2154_v54 = vadd.f32 %v2407_v33, %v2153_v40  ;;  %v2704_v41 = vpop.f32.mrb[63].mxu0  ;;  %v2157_v42 = vmax.f32 %v2151_v37, 0.0 }
0x1e8f   :  { %v2158_v43 = vmax.f32 %v2154_v54, 0.0 }
0x1e91   :  { %v2159_v44 = vpack.c.bf16 %v2158_v43, %v2157_v42 }
0x1e93   :  { %2710 = vmatmul.mubr.msk.bf16.vlgmr.msra.gmra.mrb[40].mxu1 %vm122_vm3, %v2159_v44 }
0x1f66   :  { %v2218_v47 = vpop.f32.mrb[40].mxu1 }
0x1f67   :  { %v2219_v48 = vadd.f32 %v2411_v46, %v2218_v47  ;;  %v2711_v49 = vpop.f32.mrb[41].mxu1 }
0x1f68   :  { %v2221_v50 = vpop.f32.mrb[42].mxu1 }
0x1f69   :  { %v2222_v51 = vadd.f32 %v2411_v46, %v2221_v50  ;;  %v2712_v53 = vpop.f32.mrb[43].mxu1  ;;  %v2225_v55 = vmax.f32 %v2219_v48, 0.0 }
0x1f6b   :  { %v2226_v56 = vmax.f32 %v2222_v51, 0.0 }
0x1f6d   :  { %v2229_v57 = vpack.c.bf16 %v2226_v56, %v2225_v55 }
0x1f6f   :  { %v2239_v58 = vsel %vm122_vm3, %v2229_v57, 0 }
0x1f70   :  { %2714 = vmatpush3.bf16.xpose.msra.mxu0 %v2239_v58 }
0x1f77   :  { %2716 = vmatmul.mubr.msk.bf16.vlgmr.msra.gmra.mrb[64].mxu0 %vm122_vm3, %v2787_v59 }
0x204a   :  { %v2275_v61 = vpop.f32.mrb[64].mxu0 }
0x204b   :  { %v2287_v62 = vadd.f32 %v2285_v60, %v2275_v61  ;;  %v2717_v63 = vpop.f32.mrb[65].mxu0 }
0x204c   :  { %v2278_v24 = vpop.f32.mrb[66].mxu0 }
0x204d   :  { %v2288_v25 = vsub.f32 0.0, %v2287_v62  ;;  %v2718_v0 = vpop.f32.mrb[67].mxu0 }
0x204f   :  { %v2289_v1 = vmul.f32 1.442695, %v2288_v25 }
0x2051   :  { %2860 = vpow2.f32 %v2289_v1 }
0x205b   :  { %v2861_v3 = vpop.eup %2860 }
0x205c   :  { %v2291_v4 = vadd.f32 1.0, %v2861_v3 }
0x205e   :  { %2862 = vrcp.f32 %v2291_v4 }
0x2068   :  { %v2863_v5 = vpop.eup %2862 }
0x2069   :  { %v2295_v34 = vsel %vm2294_vm5, %v2863_v5, -inf }
0x206a   :  { %2296 = vmax.xlane.f32.xlu0 %v2295_v34 }
0x20f7   :  { %v2297_v35 = vpop.xlane.xlu0 %2296 }
0x20f8   :  { %2864 = vrcp.f32 %v2297_v35 }
0x2102   :  { %v2865_v6 = vpop.eup %2864 }
0x2103   :  { %v2299_v7 = vmul.f32 %v2865_v6, %v2863_v5 }
0x2105   :  { %2300 = vst.msk [vmem:[#allocation2] sm:$0x1] %vm2294_vm5, %v2299_v7 }
0x2106   :  { %2879 = shalt.err (!%p2876_p4)
}
0x2107   :  { %s2880_s11 = scalar_lea.hbm %s3466_s4, 16 }
0x2108   :  { %p2881_p5 = scmp.ne.s32.totalorder %s3466_s4, %s2880_s11  ;;  %p2884_p6 = scmp.lt.u32.totalorder %s2880_s11, %s3466_s4 }
0x210a   :  { %p2886_p7 = pnand %p2884_p6, %p2881_p5 }
0x210c   :  { %2889 = shalt.err (!%p2886_p7)
}
0x210d   :  { %2310 = dma.vmem_to_hbm [thread:$0]  %s2308_s2, 16, %s3466_s4, [#allocation3]  }
0x210e   :  { %2890 = dma.done.wait [#allocation3], 16  }
0x210f   :  { %2891 = vsyncadd [#allocation3], 4294967280 }
0x2110   :  { %2314 = vsyncpa [#allocation3], 1 }

</bundles_post_ra>
